<compile_context>
chip_gen: v7x
topology: tpu7x:2x2x1
jax: 0.10.0
libtpu: 0.0.40
codegen_flags: <defaults>
</compile_context>

<pallas_src>
import math
import jax
import jax.numpy as jnp
from jax.experimental import pallas as pl
from jax.experimental.pallas import tpu as pltpu

# -------- small config (same structure as VampNet, sizes shrunk) --------
B = 2              # batch
T = 16             # sequence length (<=128 so the `out[:, :128]` crop is a no-op)
D = 128            # embedding_dim (d_model)
H = 4              # n_heads
DH = D // H        # d_head
N_LAYERS = 2       # n_layers
VOCAB = 64         # vocab_size
VPAD = 128         # lane-dense padded vocab (classifier output width)
NUM_BUCKETS = 32   # attention_num_buckets
MAX_DISTANCE = 128
EPS = 1e-6
MASK_VALUE = -1e9  # _MASKING_VALUE for f32 in the PyTorch reference
# TODO(synk): EMPTY_TOKEN constant is not defined in the snippet; assume the last vocab
# index marks "empty" so the embedding lookup stays in range.
EMPTY_TOKEN = VOCAB - 1
# TODO(synk): FiLM is not provided in the snippet; VampNet uses d_cond=0, which makes
# FiLM an identity, so it is omitted here.  Dropout layers are identity at inference.


def _gelu_tanh(x):
    # NewGELU (tanh approximation) used inside GatedGELU
    return 0.5 * x * (1.0 + jnp.tanh(math.sqrt(2.0 / math.pi) * (x + 0.044715 * x * x * x)))


def _rmsnorm(x, w):
    var = jnp.mean(x * x, axis=-1, keepdims=True)
    return x * jax.lax.rsqrt(var + EPS) * w


# ----------------------------- the fused Pallas kernel -----------------------------
def vampnet_stack_kernel(x_ref, bias_ref,
                         n1_ref, wqkv_ref, wfc_ref, n3_ref, w1_ref, w2_ref,
                         fnw_ref, wc_ref, bc_ref,
                         o_ref, x_sc):
    """One grid step == one TransformerLayer.  The residual stream stays resident in
    x_sc (VMEM) across grid steps.
      x:(B*T,D) bias:(H,B,T,T) [pos bias + key-mask fill, precomputed]
      n1/n3:(1,D) wqkv:(D,3D) wfc:(D,D) w1:(D,4D) w2:(2D,D)
      fnw:(1,D) wc:(D,VPAD) bc:(1,VPAD)  out:(B*T,VPAD)."""
    layer = pl.program_id(0)
    bf16 = jnp.bfloat16

    @pl.when(layer == 0)
    def _():
        x_sc[...] = x_ref[...]

    x = x_sc[...]                                           # [B*T, D] f32 residual stream

    # ---------------- self-attention block ----------------
    y = _rmsnorm(x, n1_ref[...])                            # FiLM(d_cond=0) is identity
    qkv = jnp.dot(y.astype(bf16), wqkv_ref[...],
                  preferred_element_type=jnp.float32)       # [B*T, 3D] f32
    # cast once, hoisted out of the head loop (lane slices land on 128-lane bounds)
    q = qkv[:, :D].astype(bf16)
    k = qkv[:, D:2 * D].astype(bf16)
    v = qkv[:, 2 * D:].astype(bf16)

    bias = bias_ref[...]                                    # [H, B, T, T] loaded once
    scale = 1.0 / math.sqrt(DH)

    head_outs = []
    for h in range(H):                                      # static unroll over heads
        qh = q[:, h * DH:(h + 1) * DH].reshape(B, T, DH)
        kh = k[:, h * DH:(h + 1) * DH].reshape(B, T, DH)
        vh = v[:, h * DH:(h + 1) * DH].reshape(B, T, DH)
        # batched over B (leading batch dim), f32 accumulation
        s = jnp.einsum('bqd,bkd->bqk', qh, kh,
                       preferred_element_type=jnp.float32) * scale      # [B,T,T]
        # precomputed (position bias + (mask==0)*-1e9); additive masking gives the same
        # softmax as PyTorch's masked_fill except for fully-masked rows (negligible here)
        s = s + bias[h]
        s = s - jnp.max(s, axis=-1, keepdims=True)
        p = jnp.exp(s)
        p = p * pl.reciprocal(jnp.sum(p, axis=-1, keepdims=True), approx=True)
        oh = jnp.einsum('bqk,bkd->bqd', p.astype(bf16), vh,
                        preferred_element_type=jnp.float32)             # [B,T,DH]
        head_outs.append(oh.reshape(B * T, DH))
    # in-register lane concatenate of the 4 head outputs, then ONE K=128 W_fc matmul
    attn = jnp.concatenate(head_outs, axis=-1)              # [B*T, D]
    x = x + jnp.dot(attn.astype(bf16), wfc_ref[...],
                    preferred_element_type=jnp.float32)     # residual (dropout=identity)

    # ---------------- feed-forward (GEGLU) block ----------------
    y = _rmsnorm(x, n3_ref[...])
    hdn = jnp.dot(y.astype(bf16), w1_ref[...],
                  preferred_element_type=jnp.float32)       # [B*T, 4D]
    a = hdn[:, :2 * D] * _gelu_tanh(hdn[:, 2 * D:])         # GatedGELU: p1 * gelu(p2)
    x = x + jnp.dot(a.astype(bf16), w2_ref[...],
                    preferred_element_type=jnp.float32)     # residual

    x_sc[...] = x

    # ---------------- classifier (only after the last layer) ----------------
    @pl.when(layer == N_LAYERS - 1)
    def _():
        yf = _rmsnorm(x, fnw_ref[...])
        o_ref[...] = (jnp.dot(yf.astype(bf16), wc_ref[...],
                              preferred_element_type=jnp.float32)
                      + bc_ref[...])                        # [B*T, VPAD]


def vampnet_pallas(x2d, bias_masked, p):
    return pl.pallas_call(
        vampnet_stack_kernel,
        out_shape=jax.ShapeDtypeStruct((B * T, VPAD), jnp.float32),
        grid=(N_LAYERS,),
        in_specs=[
            pl.BlockSpec((B * T, D), lambda l: (0, 0)),            # x (embeddings, 2-D slab)
            pl.BlockSpec((H, B, T, T), lambda l: (0, 0, 0, 0)),    # masked position bias
            pl.BlockSpec((None, 1, D), lambda l: (l, 0, 0)),       # norm1_w[l]
            pl.BlockSpec((None, D, 3 * D), lambda l: (l, 0, 0)),   # wqkv[l]
            pl.BlockSpec((None, D, D), lambda l: (l, 0, 0)),       # wfc[l]
            pl.BlockSpec((None, 1, D), lambda l: (l, 0, 0)),       # norm3_w[l]
            pl.BlockSpec((None, D, 4 * D), lambda l: (l, 0, 0)),   # w1[l]
            pl.BlockSpec((None, 2 * D, D), lambda l: (l, 0, 0)),   # w2[l]
            pl.BlockSpec((1, D), lambda l: (0, 0)),                # final_norm_w
            pl.BlockSpec((D, VPAD), lambda l: (0, 0)),             # classifier weight
            pl.BlockSpec((1, VPAD), lambda l: (0, 0)),             # classifier bias
        ],
        out_specs=pl.BlockSpec((B * T, VPAD), lambda l: (0, 0)),
        scratch_shapes=[pltpu.VMEM((B * T, D), jnp.float32)],      # resident residual
        compiler_params=pltpu.CompilerParams(dimension_semantics=("arbitrary",)),
    )(x2d, bias_masked,
      p["norm1_w"], p["wqkv"], p["wfc"], p["norm3_w"], p["w1"], p["w2"],
      p["final_norm_w"], p["wc"], p["bc"])


# ------------- glue (plain JAX): embeddings, relative position bias, mask fold -------------
def compute_position_bias(rel_bias_emb, t):
    """T5-style relative position bias (bidirectional). Returns [H, T, T]."""
    q_pos = jnp.arange(t, dtype=jnp.int32)[:, None]
    k_pos = jnp.arange(t, dtype=jnp.int32)[None, :]
    rel = k_pos - q_pos                                     # [T, T]
    nb = NUM_BUCKETS // 2
    buckets = (rel > 0).astype(jnp.int32) * nb
    relp = jnp.abs(rel)
    max_exact = nb // 2
    is_small = relp < max_exact
    large = max_exact + (jnp.log(relp.astype(jnp.float32) / max_exact)
                         / math.log(MAX_DISTANCE / max_exact)
                         * (nb - max_exact)).astype(jnp.int32)
    large = jnp.minimum(large, nb - 1)
    buckets = buckets + jnp.where(is_small, relp, large)    # [T, T]
    values = rel_bias_emb[buckets]                          # [T, T, H]
    return jnp.transpose(values, (2, 0, 1))                 # 'q k h -> h q k'


def vampnet_forward(params, x_ids, target_condition):
    key_mask = (x_ids != EMPTY_TOKEN)                                     # [B, T]
    x = params["embedding"][x_ids] + params["target_embedding"][target_condition]
    pos_bias = compute_position_bias(params["rel_bias"], T)               # [H, T, T]
    # Fold the key-padding mask into the (layer-invariant) additive bias once, in JAX.
    neg = jnp.where(key_mask, 0.0, MASK_VALUE).astype(jnp.float32)        # [B, T]
    bias_masked = pos_bias[:, None, :, :] + neg[None, :, None, :]         # [H, B, T, T]
    logits = vampnet_pallas(x.reshape(B * T, D), bias_masked, params)     # [B*T, VPAD]
    # out[:, :128] crop before the classifier is a no-op for T <= 128.
    logits_btv = logits.reshape(B, T, VPAD)[:, :, :VOCAB]
    return jnp.transpose(logits_btv, (0, 2, 1))             # [B, vocab, T] (NCL, like PyTorch)


# ----------------------------- deterministic init -----------------------------
def init_params(key):
    def nrm(k, shape, scale=0.02):
        return jax.random.normal(k, shape, jnp.float32) * scale

    keys = iter(jax.random.split(key, 5 + 6 * N_LAYERS))
    emb = nrm(next(keys), (VOCAB, D))
    temb = nrm(next(keys), (2, D))
    rel_bias = nrm(next(keys), (NUM_BUCKETS, H))            # only layer 0 has it (shared)
    wc = jnp.zeros((D, VPAD), jnp.float32).at[:, :VOCAB].set(nrm(next(keys), (D, VOCAB)))
    bc = jnp.zeros((1, VPAD), jnp.float32).at[:, :VOCAB].set(nrm(next(keys), (1, VOCAB)))

    wqkv, wfc, w1, w2 = [], [], [], []
    for _ in range(N_LAYERS):
        wqkv.append(jnp.concatenate([nrm(next(keys), (D, D)),   # stored [in, out] (= W.T)
                                     nrm(next(keys), (D, D)),
                                     nrm(next(keys), (D, D))], axis=-1))
        wfc.append(nrm(next(keys), (D, D)))
        w1.append(nrm(next(keys), (D, 4 * D)))
        w2.append(nrm(next(keys), (2 * D, D)))

    return {
        "embedding": emb,
        "target_embedding": temb,
        "rel_bias": rel_bias,
        "norm1_w": jnp.ones((N_LAYERS, 1, D), jnp.float32),
        "wqkv": jnp.stack(wqkv).astype(jnp.bfloat16),        # [L, D, 3D]
        "wfc": jnp.stack(wfc).astype(jnp.bfloat16),          # [L, D, D]
        "norm3_w": jnp.ones((N_LAYERS, 1, D), jnp.float32),
        "w1": jnp.stack(w1).astype(jnp.bfloat16),            # [L, D, 4D]
        "w2": jnp.stack(w2).astype(jnp.bfloat16),            # [L, 2D, D]
        "final_norm_w": jnp.ones((1, D), jnp.float32),
        "wc": wc.astype(jnp.bfloat16),                       # [D, VPAD], zero-padded cols
        "bc": bc,                                            # [1, VPAD] f32
    }


if __name__ == "__main__":
    key = jax.random.PRNGKey(0)
    k_params, k_x, k_tc = jax.random.split(key, 3)
    params = init_params(k_params)

    x_ids = jax.random.randint(k_x, (B, T), 0, VOCAB, dtype=jnp.int32)
    target_condition = jax.random.randint(k_tc, (B, T), 0, 2, dtype=jnp.int32)

    out = jax.jit(vampnet_forward)(params, x_ids, target_condition)
    jax.block_until_ready(out)
    assert out.shape == (B, VOCAB, min(T, 128)) and out.dtype == jnp.float32
    print("KERNEL_OK")
</pallas_src>

<mosaic_0001>
module attributes {stable_mosaic.version = 11 : i64} {
  func.func @vampnet_stack_kernel(%arg0: i32, %arg1: memref<32x128xf32, #tpu.memory_space<vmem>>, %arg2: memref<4x2x16x16xf32, #tpu.memory_space<vmem>>, %arg3: memref<1x1x128xf32, #tpu.memory_space<vmem>>, %arg4: memref<1x128x384xbf16, #tpu.memory_space<vmem>>, %arg5: memref<1x128x128xbf16, #tpu.memory_space<vmem>>, %arg6: memref<1x1x128xf32, #tpu.memory_space<vmem>>, %arg7: memref<1x128x512xbf16, #tpu.memory_space<vmem>>, %arg8: memref<1x256x128xbf16, #tpu.memory_space<vmem>>, %arg9: memref<1x128xf32, #tpu.memory_space<vmem>>, %arg10: memref<128x128xbf16, #tpu.memory_space<vmem>>, %arg11: memref<1x128xf32, #tpu.memory_space<vmem>>, %arg12: memref<32x128xf32, #tpu.memory_space<vmem>>, %arg13: memref<32x128xf32, #tpu.memory_space<vmem>>) attributes {dimension_semantics = [#tpu.dimension_semantics<arbitrary>], iteration_bounds = array<i64: 2>, scalar_prefetch = 0 : i64, scratch_operands = 1 : i64, tpu.core_type = #tpu.core_type<tc>, window_params = [{pipeline_mode = #tpu.pipeline_mode<synchronous>, transform_indices = @transform_0, window_bounds = array<i64: 32, 128>}, {pipeline_mode = #tpu.pipeline_mode<synchronous>, transform_indices = @transform_1, window_bounds = array<i64: 4, 2, 16, 16>}, {transform_indices = @transform_2, window_bounds = array<i64: 1, 1, 128>}, {transform_indices = @transform_3, window_bounds = array<i64: 1, 128, 384>}, {transform_indices = @transform_4, window_bounds = array<i64: 1, 128, 128>}, {transform_indices = @transform_5, window_bounds = array<i64: 1, 1, 128>}, {transform_indices = @transform_6, window_bounds = array<i64: 1, 128, 512>}, {transform_indices = @transform_7, window_bounds = array<i64: 1, 256, 128>}, {pipeline_mode = #tpu.pipeline_mode<synchronous>, transform_indices = @transform_8, window_bounds = array<i64: 1, 128>}, {pipeline_mode = #tpu.pipeline_mode<synchronous>, transform_indices = @transform_9, window_bounds = array<i64: 128, 128>}, {pipeline_mode = #tpu.pipeline_mode<synchronous>, transform_indices = @transform_10, window_bounds = array<i64: 1, 128>}, {pipeline_mode = #tpu.pipeline_mode<synchronous>, transform_indices = @transform_11, window_bounds = array<i64: 32, 128>}]} {
    %c0_i32 = arith.constant 0 : i32
    %0 = arith.cmpi eq, %arg0, %c0_i32 : i32
    %1 = arith.extui %0 : i1 to i32
    %c0_i32_0 = arith.constant 0 : i32
    %2 = arith.cmpi ne, %1, %c0_i32_0 : i32
    scf.if %2 {
      %c0_60 = arith.constant 0 : index
      %c0_61 = arith.constant 0 : index
      %178 = vector.load %arg1[%c0_60, %c0_61] : memref<32x128xf32, #tpu.memory_space<vmem>>, vector<32x128xf32>
      %c0_62 = arith.constant 0 : index
      %c0_63 = arith.constant 0 : index
      %179 = vector.load %arg13[%c0_62, %c0_63] : memref<32x128xf32, #tpu.memory_space<vmem>>, vector<32x128xf32>
      tpu.vector_store %arg13[%c0_62, %c0_63], %178 {strides = array<i32>} : memref<32x128xf32, #tpu.memory_space<vmem>>, vector<32x128xf32>,
    } else {
    }
    %c0 = arith.constant 0 : index
    %c0_1 = arith.constant 0 : index
    %3 = vector.load %arg13[%c0, %c0_1] : memref<32x128xf32, #tpu.memory_space<vmem>>, vector<32x128xf32>
    %c0_2 = arith.constant 0 : index
    %c0_3 = arith.constant 0 : index
    %c0_4 = arith.constant 0 : index
    %4 = vector.load %arg3[%c0_2, %c0_3, %c0_4] : memref<1x1x128xf32, #tpu.memory_space<vmem>>, vector<1x1x128xf32>
    %5 = vector.shape_cast %4 : vector<1x1x128xf32> to vector<1x128xf32>
    %6 = arith.mulf %3, %3 : vector<32x128xf32>
    %cst = arith.constant dense<0.000000e+00> : vector<32xf32>
    %7 = vector.multi_reduction <add>, %6, %cst [1] : vector<32x128xf32> to vector<32xf32>
    %8 = vector.shape_cast %7 : vector<32xf32> to vector<32x1xf32>
    %cst_5 = arith.constant 1.280000e+02 : f32
    %9 = vector.broadcast %cst_5 : f32 to vector<32x1xf32>
    %10 = arith.divf %8, %9 : vector<32x1xf32>
    %cst_6 = arith.constant 9.99999997E-7 : f32
    %11 = vector.broadcast %cst_6 : f32 to vector<32x1xf32>
    %12 = arith.addf %10, %11 : vector<32x1xf32>
    %13 = math.rsqrt %12 : vector<32x1xf32>
    %14 = vector.broadcast %13 : vector<32x1xf32> to vector<32x128xf32>
    %15 = arith.mulf %3, %14 : vector<32x128xf32>
    %16 = vector.broadcast %5 : vector<1x128xf32> to vector<32x128xf32>
    %17 = arith.mulf %15, %16 : vector<32x128xf32>
    %18 = arith.truncf %17 : vector<32x128xf32> to vector<32x128xbf16>
    %c0_7 = arith.constant 0 : index
    %c0_8 = arith.constant 0 : index
    %c0_9 = arith.constant 0 : index
    %19 = vector.load %arg4[%c0_7, %c0_8, %c0_9] : memref<1x128x384xbf16, #tpu.memory_space<vmem>>, vector<1x128x384xbf16>
    %20 = vector.shape_cast %19 : vector<1x128x384xbf16> to vector<128x384xbf16>
    %cst_10 = arith.constant dense<0.000000e+00> : vector<32x384xf32>
    %21 = tpu.matmul %18, %20, %cst_10 {dimension_numbers = #tpu.dot_dimension_numbers<[1], [0], [0], [1], [0, 0, 1, 1], [], []>} : vector<32x128xbf16>, vector<128x384xbf16>, vector<32x384xf32> -> vector<32x384xf32>
    %22 = vector.extract_strided_slice %21 {offsets = [0, 0], sizes = [32, 128], strides = [1, 1]} : vector<32x384xf32> to vector<32x128xf32>
    %23 = arith.truncf %22 : vector<32x128xf32> to vector<32x128xbf16>
    %24 = vector.extract_strided_slice %21 {offsets = [0, 128], sizes = [32, 128], strides = [1, 1]} : vector<32x384xf32> to vector<32x128xf32>
    %25 = arith.truncf %24 : vector<32x128xf32> to vector<32x128xbf16>
    %26 = vector.extract_strided_slice %21 {offsets = [0, 256], sizes = [32, 128], strides = [1, 1]} : vector<32x384xf32> to vector<32x128xf32>
    %27 = arith.truncf %26 : vector<32x128xf32> to vector<32x128xbf16>
    %c0_11 = arith.constant 0 : index
    %c0_12 = arith.constant 0 : index
    %c0_13 = arith.constant 0 : index
    %c0_14 = arith.constant 0 : index
    %28 = vector.load %arg2[%c0_11, %c0_12, %c0_13, %c0_14] : memref<4x2x16x16xf32, #tpu.memory_space<vmem>>, vector<4x2x16x16xf32>
    %29 = vector.extract_strided_slice %23 {offsets = [0, 0], sizes = [32, 32], strides = [1, 1]} : vector<32x128xbf16> to vector<32x32xbf16>
    %30 = vector.shape_cast %29 : vector<32x32xbf16> to vector<2x16x32xbf16>
    %31 = vector.extract_strided_slice %25 {offsets = [0, 0], sizes = [32, 32], strides = [1, 1]} : vector<32x128xbf16> to vector<32x32xbf16>
    %32 = vector.shape_cast %31 : vector<32x32xbf16> to vector<2x16x32xbf16>
    %33 = vector.extract_strided_slice %27 {offsets = [0, 0], sizes = [32, 32], strides = [1, 1]} : vector<32x128xbf16> to vector<32x32xbf16>
    %34 = vector.shape_cast %33 : vector<32x32xbf16> to vector<2x16x32xbf16>
    "tpu.trace_start"() <{level = 10 : i32, message = "bqd,bkd->bqk"}> : () -> ()
    %cst_15 = arith.constant dense<0.000000e+00> : vector<2x16x16xf32>
    %35 = tpu.matmul %30, %32, %cst_15 {dimension_numbers = #tpu.dot_dimension_numbers<[2], [2], [1], [1], [0, 0, 0, 1, 1, 1], [0], [0]>} : vector<2x16x32xbf16>, vector<2x16x32xbf16>, vector<2x16x16xf32> -> vector<2x16x16xf32>
    "tpu.trace_stop"() : () -> ()
    %cst_16 = arith.constant 0.176776692 : f32
    %36 = vector.broadcast %cst_16 : f32 to vector<2x16x16xf32>
    %37 = arith.mulf %35, %36 : vector<2x16x16xf32>
    %38 = vector.extract_strided_slice %28 {offsets = [0, 0, 0, 0], sizes = [1, 2, 16, 16], strides = [1, 1, 1, 1]} : vector<4x2x16x16xf32> to vector<1x2x16x16xf32>
    %39 = vector.shape_cast %38 : vector<1x2x16x16xf32> to vector<2x16x16xf32>
    %40 = arith.addf %37, %39 : vector<2x16x16xf32>
    %cst_17 = arith.constant dense<0xFF800000> : vector<2x16xf32>
    %41 = vector.multi_reduction <maximumf>, %40, %cst_17 [2] : vector<2x16x16xf32> to vector<2x16xf32>
    %42 = vector.shape_cast %41 : vector<2x16xf32> to vector<2x16x1xf32>
    %43 = vector.broadcast %42 : vector<2x16x1xf32> to vector<2x16x16xf32>
    %44 = arith.subf %40, %43 : vector<2x16x16xf32>
    %45 = math.exp %44 : vector<2x16x16xf32>
    %cst_18 = arith.constant dense<0.000000e+00> : vector<2x16xf32>
    %46 = vector.multi_reduction <add>, %45, %cst_18 [2] : vector<2x16x16xf32> to vector<2x16xf32>
    %47 = vector.shape_cast %46 : vector<2x16xf32> to vector<2x16x1xf32>
    %48 = tpu.reciprocal %47 {approx = true} : vector<2x16x1xf32> -> vector<2x16x1xf32>
    %49 = vector.broadcast %48 : vector<2x16x1xf32> to vector<2x16x16xf32>
    %50 = arith.mulf %45, %49 : vector<2x16x16xf32>
    %51 = arith.truncf %50 : vector<2x16x16xf32> to vector<2x16x16xbf16>
    "tpu.trace_start"() <{level = 10 : i32, message = "bqk,bkd->bqd"}> : () -> ()
    %cst_19 = arith.constant dense<0.000000e+00> : vector<2x16x32xf32>
    %52 = tpu.matmul %51, %34, %cst_19 {dimension_numbers = #tpu.dot_dimension_numbers<[2], [1], [1], [2], [0, 0, 0, 1, 1, 2], [0], [0]>} : vector<2x16x16xbf16>, vector<2x16x32xbf16>, vector<2x16x32xf32> -> vector<2x16x32xf32>
    "tpu.trace_stop"() : () -> ()
    %53 = vector.shape_cast %52 : vector<2x16x32xf32> to vector<32x32xf32>
    %54 = vector.extract_strided_slice %23 {offsets = [0, 32], sizes = [32, 32], strides = [1, 1]} : vector<32x128xbf16> to vector<32x32xbf16>
    %55 = vector.shape_cast %54 : vector<32x32xbf16> to vector<2x16x32xbf16>
    %56 = vector.extract_strided_slice %25 {offsets = [0, 32], sizes = [32, 32], strides = [1, 1]} : vector<32x128xbf16> to vector<32x32xbf16>
    %57 = vector.shape_cast %56 : vector<32x32xbf16> to vector<2x16x32xbf16>
    %58 = vector.extract_strided_slice %27 {offsets = [0, 32], sizes = [32, 32], strides = [1, 1]} : vector<32x128xbf16> to vector<32x32xbf16>
    %59 = vector.shape_cast %58 : vector<32x32xbf16> to vector<2x16x32xbf16>
    "tpu.trace_start"() <{level = 10 : i32, message = "bqd,bkd->bqk"}> : () -> ()
    %cst_20 = arith.constant dense<0.000000e+00> : vector<2x16x16xf32>
    %60 = tpu.matmul %55, %57, %cst_20 {dimension_numbers = #tpu.dot_dimension_numbers<[2], [2], [1], [1], [0, 0, 0, 1, 1, 1], [0], [0]>} : vector<2x16x32xbf16>, vector<2x16x32xbf16>, vector<2x16x16xf32> -> vector<2x16x16xf32>
    "tpu.trace_stop"() : () -> ()
    %cst_21 = arith.constant 0.176776692 : f32
    %61 = vector.broadcast %cst_21 : f32 to vector<2x16x16xf32>
    %62 = arith.mulf %60, %61 : vector<2x16x16xf32>
    %63 = vector.extract_strided_slice %28 {offsets = [1, 0, 0, 0], sizes = [1, 2, 16, 16], strides = [1, 1, 1, 1]} : vector<4x2x16x16xf32> to vector<1x2x16x16xf32>
    %64 = vector.shape_cast %63 : vector<1x2x16x16xf32> to vector<2x16x16xf32>
    %65 = arith.addf %62, %64 : vector<2x16x16xf32>
    %cst_22 = arith.constant dense<0xFF800000> : vector<2x16xf32>
    %66 = vector.multi_reduction <maximumf>, %65, %cst_22 [2] : vector<2x16x16xf32> to vector<2x16xf32>
    %67 = vector.shape_cast %66 : vector<2x16xf32> to vector<2x16x1xf32>
    %68 = vector.broadcast %67 : vector<2x16x1xf32> to vector<2x16x16xf32>
    %69 = arith.subf %65, %68 : vector<2x16x16xf32>
    %70 = math.exp %69 : vector<2x16x16xf32>
    %cst_23 = arith.constant dense<0.000000e+00> : vector<2x16xf32>
    %71 = vector.multi_reduction <add>, %70, %cst_23 [2] : vector<2x16x16xf32> to vector<2x16xf32>
    %72 = vector.shape_cast %71 : vector<2x16xf32> to vector<2x16x1xf32>
    %73 = tpu.reciprocal %72 {approx = true} : vector<2x16x1xf32> -> vector<2x16x1xf32>
    %74 = vector.broadcast %73 : vector<2x16x1xf32> to vector<2x16x16xf32>
    %75 = arith.mulf %70, %74 : vector<2x16x16xf32>
    %76 = arith.truncf %75 : vector<2x16x16xf32> to vector<2x16x16xbf16>
    "tpu.trace_start"() <{level = 10 : i32, message = "bqk,bkd->bqd"}> : () -> ()
    %cst_24 = arith.constant dense<0.000000e+00> : vector<2x16x32xf32>
    %77 = tpu.matmul %76, %59, %cst_24 {dimension_numbers = #tpu.dot_dimension_numbers<[2], [1], [1], [2], [0, 0, 0, 1, 1, 2], [0], [0]>} : vector<2x16x16xbf16>, vector<2x16x32xbf16>, vector<2x16x32xf32> -> vector<2x16x32xf32>
    "tpu.trace_stop"() : () -> ()
    %78 = vector.shape_cast %77 : vector<2x16x32xf32> to vector<32x32xf32>
    %79 = vector.extract_strided_slice %23 {offsets = [0, 64], sizes = [32, 32], strides = [1, 1]} : vector<32x128xbf16> to vector<32x32xbf16>
    %80 = vector.shape_cast %79 : vector<32x32xbf16> to vector<2x16x32xbf16>
    %81 = vector.extract_strided_slice %25 {offsets = [0, 64], sizes = [32, 32], strides = [1, 1]} : vector<32x128xbf16> to vector<32x32xbf16>
    %82 = vector.shape_cast %81 : vector<32x32xbf16> to vector<2x16x32xbf16>
    %83 = vector.extract_strided_slice %27 {offsets = [0, 64], sizes = [32, 32], strides = [1, 1]} : vector<32x128xbf16> to vector<32x32xbf16>
    %84 = vector.shape_cast %83 : vector<32x32xbf16> to vector<2x16x32xbf16>
    "tpu.trace_start"() <{level = 10 : i32, message = "bqd,bkd->bqk"}> : () -> ()
    %cst_25 = arith.constant dense<0.000000e+00> : vector<2x16x16xf32>
    %85 = tpu.matmul %80, %82, %cst_25 {dimension_numbers = #tpu.dot_dimension_numbers<[2], [2], [1], [1], [0, 0, 0, 1, 1, 1], [0], [0]>} : vector<2x16x32xbf16>, vector<2x16x32xbf16>, vector<2x16x16xf32> -> vector<2x16x16xf32>
    "tpu.trace_stop"() : () -> ()
    %cst_26 = arith.constant 0.176776692 : f32
    %86 = vector.broadcast %cst_26 : f32 to vector<2x16x16xf32>
    %87 = arith.mulf %85, %86 : vector<2x16x16xf32>
    %88 = vector.extract_strided_slice %28 {offsets = [2, 0, 0, 0], sizes = [1, 2, 16, 16], strides = [1, 1, 1, 1]} : vector<4x2x16x16xf32> to vector<1x2x16x16xf32>
    %89 = vector.shape_cast %88 : vector<1x2x16x16xf32> to vector<2x16x16xf32>
    %90 = arith.addf %87, %89 : vector<2x16x16xf32>
    %cst_27 = arith.constant dense<0xFF800000> : vector<2x16xf32>
    %91 = vector.multi_reduction <maximumf>, %90, %cst_27 [2] : vector<2x16x16xf32> to vector<2x16xf32>
    %92 = vector.shape_cast %91 : vector<2x16xf32> to vector<2x16x1xf32>
    %93 = vector.broadcast %92 : vector<2x16x1xf32> to vector<2x16x16xf32>
    %94 = arith.subf %90, %93 : vector<2x16x16xf32>
    %95 = math.exp %94 : vector<2x16x16xf32>
    %cst_28 = arith.constant dense<0.000000e+00> : vector<2x16xf32>
    %96 = vector.multi_reduction <add>, %95, %cst_28 [2] : vector<2x16x16xf32> to vector<2x16xf32>
    %97 = vector.shape_cast %96 : vector<2x16xf32> to vector<2x16x1xf32>
    %98 = tpu.reciprocal %97 {approx = true} : vector<2x16x1xf32> -> vector<2x16x1xf32>
    %99 = vector.broadcast %98 : vector<2x16x1xf32> to vector<2x16x16xf32>
    %100 = arith.mulf %95, %99 : vector<2x16x16xf32>
    %101 = arith.truncf %100 : vector<2x16x16xf32> to vector<2x16x16xbf16>
    "tpu.trace_start"() <{level = 10 : i32, message = "bqk,bkd->bqd"}> : () -> ()
    %cst_29 = arith.constant dense<0.000000e+00> : vector<2x16x32xf32>
    %102 = tpu.matmul %101, %84, %cst_29 {dimension_numbers = #tpu.dot_dimension_numbers<[2], [1], [1], [2], [0, 0, 0, 1, 1, 2], [0], [0]>} : vector<2x16x16xbf16>, vector<2x16x32xbf16>, vector<2x16x32xf32> -> vector<2x16x32xf32>
    "tpu.trace_stop"() : () -> ()
    %103 = vector.shape_cast %102 : vector<2x16x32xf32> to vector<32x32xf32>
    %104 = vector.extract_strided_slice %23 {offsets = [0, 96], sizes = [32, 32], strides = [1, 1]} : vector<32x128xbf16> to vector<32x32xbf16>
    %105 = vector.shape_cast %104 : vector<32x32xbf16> to vector<2x16x32xbf16>
    %106 = vector.extract_strided_slice %25 {offsets = [0, 96], sizes = [32, 32], strides = [1, 1]} : vector<32x128xbf16> to vector<32x32xbf16>
    %107 = vector.shape_cast %106 : vector<32x32xbf16> to vector<2x16x32xbf16>
    %108 = vector.extract_strided_slice %27 {offsets = [0, 96], sizes = [32, 32], strides = [1, 1]} : vector<32x128xbf16> to vector<32x32xbf16>
    %109 = vector.shape_cast %108 : vector<32x32xbf16> to vector<2x16x32xbf16>
    "tpu.trace_start"() <{level = 10 : i32, message = "bqd,bkd->bqk"}> : () -> ()
    %cst_30 = arith.constant dense<0.000000e+00> : vector<2x16x16xf32>
    %110 = tpu.matmul %105, %107, %cst_30 {dimension_numbers = #tpu.dot_dimension_numbers<[2], [2], [1], [1], [0, 0, 0, 1, 1, 1], [0], [0]>} : vector<2x16x32xbf16>, vector<2x16x32xbf16>, vector<2x16x16xf32> -> vector<2x16x16xf32>
    "tpu.trace_stop"() : () -> ()
    %cst_31 = arith.constant 0.176776692 : f32
    %111 = vector.broadcast %cst_31 : f32 to vector<2x16x16xf32>
    %112 = arith.mulf %110, %111 : vector<2x16x16xf32>
    %113 = vector.extract_strided_slice %28 {offsets = [3, 0, 0, 0], sizes = [1, 2, 16, 16], strides = [1, 1, 1, 1]} : vector<4x2x16x16xf32> to vector<1x2x16x16xf32>
    %114 = vector.shape_cast %113 : vector<1x2x16x16xf32> to vector<2x16x16xf32>
    %115 = arith.addf %112, %114 : vector<2x16x16xf32>
    %cst_32 = arith.constant dense<0xFF800000> : vector<2x16xf32>
    %116 = vector.multi_reduction <maximumf>, %115, %cst_32 [2] : vector<2x16x16xf32> to vector<2x16xf32>
    %117 = vector.shape_cast %116 : vector<2x16xf32> to vector<2x16x1xf32>
    %118 = vector.broadcast %117 : vector<2x16x1xf32> to vector<2x16x16xf32>
    %119 = arith.subf %115, %118 : vector<2x16x16xf32>
    %120 = math.exp %119 : vector<2x16x16xf32>
    %cst_33 = arith.constant dense<0.000000e+00> : vector<2x16xf32>
    %121 = vector.multi_reduction <add>, %120, %cst_33 [2] : vector<2x16x16xf32> to vector<2x16xf32>
    %122 = vector.shape_cast %121 : vector<2x16xf32> to vector<2x16x1xf32>
    %123 = tpu.reciprocal %122 {approx = true} : vector<2x16x1xf32> -> vector<2x16x1xf32>
    %124 = vector.broadcast %123 : vector<2x16x1xf32> to vector<2x16x16xf32>
    %125 = arith.mulf %120, %124 : vector<2x16x16xf32>
    %126 = arith.truncf %125 : vector<2x16x16xf32> to vector<2x16x16xbf16>
    "tpu.trace_start"() <{level = 10 : i32, message = "bqk,bkd->bqd"}> : () -> ()
    %cst_34 = arith.constant dense<0.000000e+00> : vector<2x16x32xf32>
    %127 = tpu.matmul %126, %109, %cst_34 {dimension_numbers = #tpu.dot_dimension_numbers<[2], [1], [1], [2], [0, 0, 0, 1, 1, 2], [0], [0]>} : vector<2x16x16xbf16>, vector<2x16x32xbf16>, vector<2x16x32xf32> -> vector<2x16x32xf32>
    "tpu.trace_stop"() : () -> ()
    %128 = vector.shape_cast %127 : vector<2x16x32xf32> to vector<32x32xf32>
    %129 = tpu.concatenate %53, %78, %103, %128 in 1 : vector<32x32xf32>, vector<32x32xf32>, vector<32x32xf32>, vector<32x32xf32> -> vector<32x128xf32>
    %130 = arith.truncf %129 : vector<32x128xf32> to vector<32x128xbf16>
    %c0_35 = arith.constant 0 : index
    %c0_36 = arith.constant 0 : index
    %c0_37 = arith.constant 0 : index
    %131 = vector.load %arg5[%c0_35, %c0_36, %c0_37] : memref<1x128x128xbf16, #tpu.memory_space<vmem>>, vector<1x128x128xbf16>
    %132 = vector.shape_cast %131 : vector<1x128x128xbf16> to vector<128x128xbf16>
    %cst_38 = arith.constant dense<0.000000e+00> : vector<32x128xf32>
    %133 = tpu.matmul %130, %132, %cst_38 {dimension_numbers = #tpu.dot_dimension_numbers<[1], [0], [0], [1], [0, 0, 1, 1], [], []>} : vector<32x128xbf16>, vector<128x128xbf16>, vector<32x128xf32> -> vector<32x128xf32>
    %134 = arith.addf %3, %133 : vector<32x128xf32>
    %c0_39 = arith.constant 0 : index
    %c0_40 = arith.constant 0 : index
    %c0_41 = arith.constant 0 : index
    %135 = vector.load %arg6[%c0_39, %c0_40, %c0_41] : memref<1x1x128xf32, #tpu.memory_space<vmem>>, vector<1x1x128xf32>
    %136 = vector.shape_cast %135 : vector<1x1x128xf32> to vector<1x128xf32>
    %137 = arith.mulf %134, %134 : vector<32x128xf32>
    %cst_42 = arith.constant dense<0.000000e+00> : vector<32xf32>
    %138 = vector.multi_reduction <add>, %137, %cst_42 [1] : vector<32x128xf32> to vector<32xf32>
    %139 = vector.shape_cast %138 : vector<32xf32> to vector<32x1xf32>
    %cst_43 = arith.constant 1.280000e+02 : f32
    %140 = vector.broadcast %cst_43 : f32 to vector<32x1xf32>
    %141 = arith.divf %139, %140 : vector<32x1xf32>
    %cst_44 = arith.constant 9.99999997E-7 : f32
    %142 = vector.broadcast %cst_44 : f32 to vector<32x1xf32>
    %143 = arith.addf %141, %142 : vector<32x1xf32>
    %144 = math.rsqrt %143 : vector<32x1xf32>
    %145 = vector.broadcast %144 : vector<32x1xf32> to vector<32x128xf32>
    %146 = arith.mulf %134, %145 : vector<32x128xf32>
    %147 = vector.broadcast %136 : vector<1x128xf32> to vector<32x128xf32>
    %148 = arith.mulf %146, %147 : vector<32x128xf32>
    %149 = arith.truncf %148 : vector<32x128xf32> to vector<32x128xbf16>
    %c0_45 = arith.constant 0 : index
    %c0_46 = arith.constant 0 : index
    %c0_47 = arith.constant 0 : index
    %150 = vector.load %arg7[%c0_45, %c0_46, %c0_47] : memref<1x128x512xbf16, #tpu.memory_space<vmem>>, vector<1x128x512xbf16>
    %151 = vector.shape_cast %150 : vector<1x128x512xbf16> to vector<128x512xbf16>
    %cst_48 = arith.constant dense<0.000000e+00> : vector<32x512xf32>
    %152 = tpu.matmul %149, %151, %cst_48 {dimension_numbers = #tpu.dot_dimension_numbers<[1], [0], [0], [1], [0, 0, 1, 1], [], []>} : vector<32x128xbf16>, vector<128x512xbf16>, vector<32x512xf32> -> vector<32x512xf32>
    %153 = vector.extract_strided_slice %152 {offsets = [0, 0], sizes = [32, 256], strides = [1, 1]} : vector<32x512xf32> to vector<32x256xf32>
    %154 = vector.extract_strided_slice %152 {offsets = [0, 256], sizes = [32, 256], strides = [1, 1]} : vector<32x512xf32> to vector<32x256xf32>
    %cst_49 = arith.constant 5.000000e-01 : f32
    %155 = vector.broadcast %cst_49 : f32 to vector<32x256xf32>
    %156 = arith.mulf %155, %154 : vector<32x256xf32>
    %cst_50 = arith.constant 4.471500e-02 : f32
    %157 = vector.broadcast %cst_50 : f32 to vector<32x256xf32>
    %158 = arith.mulf %157, %154 : vector<32x256xf32>
    %159 = arith.mulf %158, %154 : vector<32x256xf32>
    %160 = arith.mulf %159, %154 : vector<32x256xf32>
    %161 = arith.addf %154, %160 : vector<32x256xf32>
    %cst_51 = arith.constant 0.797884583 : f32
    %162 = vector.broadcast %cst_51 : f32 to vector<32x256xf32>
    %163 = arith.mulf %162, %161 : vector<32x256xf32>
    %164 = math.tanh %163 : vector<32x256xf32>
    %cst_52 = arith.constant 1.000000e+00 : f32
    %165 = vector.broadcast %cst_52 : f32 to vector<32x256xf32>
    %166 = arith.addf %165, %164 : vector<32x256xf32>
    %167 = arith.mulf %156, %166 : vector<32x256xf32>
    %168 = arith.mulf %153, %167 : vector<32x256xf32>
    %169 = arith.truncf %168 : vector<32x256xf32> to vector<32x256xbf16>
    %c0_53 = arith.constant 0 : index
    %c0_54 = arith.constant 0 : index
    %c0_55 = arith.constant 0 : index
    %170 = vector.load %arg8[%c0_53, %c0_54, %c0_55] : memref<1x256x128xbf16, #tpu.memory_space<vmem>>, vector<1x256x128xbf16>
    %171 = vector.shape_cast %170 : vector<1x256x128xbf16> to vector<256x128xbf16>
    %cst_56 = arith.constant dense<0.000000e+00> : vector<32x128xf32>
    %172 = tpu.matmul %169, %171, %cst_56 {dimension_numbers = #tpu.dot_dimension_numbers<[1], [0], [0], [1], [0, 0, 1, 1], [], []>} : vector<32x256xbf16>, vector<256x128xbf16>, vector<32x128xf32> -> vector<32x128xf32>
    %173 = arith.addf %134, %172 : vector<32x128xf32>
    %c0_57 = arith.constant 0 : index
    %c0_58 = arith.constant 0 : index
    %174 = vector.load %arg13[%c0_57, %c0_58] : memref<32x128xf32, #tpu.memory_space<vmem>>, vector<32x128xf32>
    tpu.vector_store %arg13[%c0_57, %c0_58], %173 {strides = array<i32>} : memref<32x128xf32, #tpu.memory_space<vmem>>, vector<32x128xf32>,
    %c1_i32 = arith.constant 1 : i32
    %175 = arith.cmpi eq, %arg0, %c1_i32 : i32
    %176 = arith.extui %175 : i1 to i32
    %c0_i32_59 = arith.constant 0 : i32
    %177 = arith.cmpi ne, %176, %c0_i32_59 : i32
    scf.if %177 {
      %c0_60 = arith.constant 0 : index
      %c0_61 = arith.constant 0 : index
      %178 = vector.load %arg9[%c0_60, %c0_61] : memref<1x128xf32, #tpu.memory_space<vmem>>, vector<1x128xf32>
      %179 = arith.mulf %173, %173 : vector<32x128xf32>
      %cst_62 = arith.constant dense<0.000000e+00> : vector<32xf32>
      %180 = vector.multi_reduction <add>, %179, %cst_62 [1] : vector<32x128xf32> to vector<32xf32>
      %181 = vector.shape_cast %180 : vector<32xf32> to vector<32x1xf32>
      %cst_63 = arith.constant 1.280000e+02 : f32
      %182 = vector.broadcast %cst_63 : f32 to vector<32x1xf32>
      %183 = arith.divf %181, %182 : vector<32x1xf32>
      %cst_64 = arith.constant 9.99999997E-7 : f32
      %184 = vector.broadcast %cst_64 : f32 to vector<32x1xf32>
      %185 = arith.addf %183, %184 : vector<32x1xf32>
      %186 = math.rsqrt %185 : vector<32x1xf32>
      %187 = vector.broadcast %186 : vector<32x1xf32> to vector<32x128xf32>
      %188 = arith.mulf %173, %187 : vector<32x128xf32>
      %189 = vector.broadcast %178 : vector<1x128xf32> to vector<32x128xf32>
      %190 = arith.mulf %188, %189 : vector<32x128xf32>
      %191 = arith.truncf %190 : vector<32x128xf32> to vector<32x128xbf16>
      %c0_65 = arith.constant 0 : index
      %c0_66 = arith.constant 0 : index
      %192 = vector.load %arg10[%c0_65, %c0_66] : memref<128x128xbf16, #tpu.memory_space<vmem>>, vector<128x128xbf16>
      %cst_67 = arith.constant dense<0.000000e+00> : vector<32x128xf32>
      %193 = tpu.matmul %191, %192, %cst_67 {dimension_numbers = #tpu.dot_dimension_numbers<[1], [0], [0], [1], [0, 0, 1, 1], [], []>} : vector<32x128xbf16>, vector<128x128xbf16>, vector<32x128xf32> -> vector<32x128xf32>
      %c0_68 = arith.constant 0 : index
      %c0_69 = arith.constant 0 : index
      %194 = vector.load %arg11[%c0_68, %c0_69] : memref<1x128xf32, #tpu.memory_space<vmem>>, vector<1x128xf32>
      %195 = vector.broadcast %194 : vector<1x128xf32> to vector<32x128xf32>
      %196 = arith.addf %193, %195 : vector<32x128xf32>
      %c0_70 = arith.constant 0 : index
      %c0_71 = arith.constant 0 : index
      %197 = vector.load %arg12[%c0_70, %c0_71] : memref<32x128xf32, #tpu.memory_space<vmem>>, vector<32x128xf32>
      tpu.vector_store %arg12[%c0_70, %c0_71], %196 {strides = array<i32>} : memref<32x128xf32, #tpu.memory_space<vmem>>, vector<32x128xf32>,
    } else {
    }
    return
  }
  func.func @transform_0(%arg0: i32) -> (i32, i32) {
    %c0_i32 = arith.constant 0 : i32
    %c0_i32_0 = arith.constant 0 : i32
    %c0_i32_1 = arith.constant 0 : i32
    return %c0_i32, %c0_i32_0 : i32, i32
  }
  func.func @transform_1(%arg0: i32) -> (i32, i32, i32, i32) {
    %c0_i32 = arith.constant 0 : i32
    %c0_i32_0 = arith.constant 0 : i32
    %c0_i32_1 = arith.constant 0 : i32
    %c0_i32_2 = arith.constant 0 : i32
    %c0_i32_3 = arith.constant 0 : i32
    return %c0_i32, %c0_i32_0, %c0_i32_1, %c0_i32_2 : i32, i32, i32, i32
  }
  func.func @transform_2(%arg0: i32) -> (i32, i32, i32) {
    %c0_i32 = arith.constant 0 : i32
    %c0_i32_0 = arith.constant 0 : i32
    %c0_i32_1 = arith.constant 0 : i32
    return %arg0, %c0_i32, %c0_i32_0 : i32, i32, i32
  }
  func.func @transform_3(%arg0: i32) -> (i32, i32, i32) {
    %c0_i32 = arith.constant 0 : i32
    %c0_i32_0 = arith.constant 0 : i32
    %c0_i32_1 = arith.constant 0 : i32
    return %arg0, %c0_i32, %c0_i32_0 : i32, i32, i32
  }
  func.func @transform_4(%arg0: i32) -> (i32, i32, i32) {
    %c0_i32 = arith.constant 0 : i32
    %c0_i32_0 = arith.constant 0 : i32
    %c0_i32_1 = arith.constant 0 : i32
    return %arg0, %c0_i32, %c0_i32_0 : i32, i32, i32
  }
  func.func @transform_5(%arg0: i32) -> (i32, i32, i32) {
    %c0_i32 = arith.constant 0 : i32
    %c0_i32_0 = arith.constant 0 : i32
    %c0_i32_1 = arith.constant 0 : i32
    return %arg0, %c0_i32, %c0_i32_0 : i32, i32, i32
  }
  func.func @transform_6(%arg0: i32) -> (i32, i32, i32) {
    %c0_i32 = arith.constant 0 : i32
    %c0_i32_0 = arith.constant 0 : i32
    %c0_i32_1 = arith.constant 0 : i32
    return %arg0, %c0_i32, %c0_i32_0 : i32, i32, i32
  }
  func.func @transform_7(%arg0: i32) -> (i32, i32, i32) {
    %c0_i32 = arith.constant 0 : i32
    %c0_i32_0 = arith.constant 0 : i32
    %c0_i32_1 = arith.constant 0 : i32
    return %arg0, %c0_i32, %c0_i32_0 : i32, i32, i32
  }
  func.func @transform_8(%arg0: i32) -> (i32, i32) {
    %c0_i32 = arith.constant 0 : i32
    %c0_i32_0 = arith.constant 0 : i32
    %c0_i32_1 = arith.constant 0 : i32
    return %c0_i32, %c0_i32_0 : i32, i32
  }
  func.func @transform_9(%arg0: i32) -> (i32, i32) {
    %c0_i32 = arith.constant 0 : i32
    %c0_i32_0 = arith.constant 0 : i32
    %c0_i32_1 = arith.constant 0 : i32
    return %c0_i32, %c0_i32_0 : i32, i32
  }
  func.func @transform_10(%arg0: i32) -> (i32, i32) {
    %c0_i32 = arith.constant 0 : i32
    %c0_i32_0 = arith.constant 0 : i32
    %c0_i32_1 = arith.constant 0 : i32
    return %c0_i32, %c0_i32_0 : i32, i32
  }
  func.func @transform_11(%arg0: i32) -> (i32, i32) {
    %c0_i32 = arith.constant 0 : i32
    %c0_i32_0 = arith.constant 0 : i32
    %c0_i32_1 = arith.constant 0 : i32
    return %c0_i32, %c0_i32_0 : i32, i32
  }
}

</mosaic_0001>

<bundles_post_ra>
// kernel: vampnet_forward.1
= control target key start
LH: loop header
LB: loop body
LE: loop exit
PB: predicated region body
PF: predicated region fallthrough
CT: control target
= control target key end

     0   :  { %s3548_s17 = smov 0   ;;  %s4106_s0 = inlined_call_operand.vmem [shape: f32[32,128], index: 0, kind: input, shape index: {}]   ;;  %s4107_s1 = inlined_call_operand.vmem [shape: f32[4,2,16,16], index: 1, kind: input, shape index: {}]   ;;  %s4108_s2 = inlined_call_operand.vmem [shape: f32[2,1,128], index: 2, kind: input, shape index: {}]   ;;  %s4109_s3 = inlined_call_operand.vmem [shape: bf16[2,128,384], index: 3, kind: input, shape index: {}]   ;;  %s4110_s4 = inlined_call_operand.vmem [shape: bf16[2,128,128], index: 4, kind: input, shape index: {}]   ;;  %s4111_s5 = inlined_call_operand.vmem [shape: f32[2,1,128], index: 5, kind: input, shape index: {}]   ;;  %s4112_s6 = inlined_call_operand.vmem [shape: bf16[2,128,512], index: 6, kind: input, shape index: {}]   ;;  %s4113_s7 = inlined_call_operand.vmem [shape: bf16[2,256,128], index: 7, kind: input, shape index: {}]   ;;  %s4114_s8 = inlined_call_operand.vmem [shape: f32[1,128], index: 8, kind: input, shape index: {}]   ;;  %s4115_s9 = inlined_call_operand.vmem [shape: bf16[128,128], index: 9, kind: input, shape index: {}]   ;;  %s4116_s10 = inlined_call_operand.vmem [shape: f32[1,128], index: 10, kind: input, shape index: {}]   ;;  %s4117_s11 = inlined_call_operand.vmem [shape: f32[32,128], index: 11, kind: output, shape index: {}]  }
   0x1 LB: > { %4119 = sst [smem:[#allocation3_spill]] %s3480_s17  ;;  %s3554_s18 = sadd.s32 4294967295, %s3480_s17   ;;  %s3480_s17 = sphi %s3548_s17, %s21_s17  }
   0x2   : > { %p2840_p0 = scmp.ge.s32.totalorder %s3480_s17, 1  ;;  %p378_p1 = scmp.lt.s32.totalorder %s3480_s17, 3 }
   0x4   : > { %p379_p2 = pnand %p2840_p0, %p378_p1 }
   0x5   : > { %p434_p3 = scmp.lt.s32.totalorder (!%p379_p2), %s3554_s18, 1  ;;  %p2848_p4 = scmp.ne.s32.totalorder (!%p379_p2), %s3554_s18, 0 }
   0x6   : > { %382 = sbr.rel (%p379_p2) target bundleno = 4261 (0x10a5), region = 64 }
   0xd   : > { %s3560_s19 = scalar_select %p434_p3, %s3554_s18, 1 }
   0xe   : > { %464 = sbr.rel (%p2848_p4) target bundleno = 21 (0x15), region = 68  ;;  %v465_v0 = vld [vmem:[%s4106_s0] sm:$0xff] (!%p2848_p4)  ;;  %v466_v1 = vld [vmem:[%s4106_s0 + $0x8] sm:$0xff] (!%p2848_p4)  ;;  %v467_v2 = vld [vmem:[%s4106_s0 + $0x10] sm:$0xff] (!%p2848_p4) }
   0xf   : > { %s3209_s23 = smul.u32 192, %s3560_s19  ;;  %s2960_s24 = sshll.u32 %s3560_s19, 6  ;;  %469 = vst [vmem:[#allocation2] sm:$0xff] (!%p2848_p4), %v465_v0  ;;  %470 = vst [vmem:[#allocation2 + $0x8] sm:$0xff] (!%p2848_p4), %v466_v1  ;;  %v468_v3 = vld [vmem:[%s4106_s0 + $0x18] sm:$0xff] (!%p2848_p4) }
  0x10   : > { %s449_s27 = scalar_lea.vmem %s4111_s5, %s3560_s19  ;;  %s3580_s14 = scalar_lea.vmem %s4110_s4, %s2960_s24  ;;  %471 = vst [vmem:[#allocation2 + $0x10] sm:$0xff] (!%p2848_p4), %v467_v2  ;;  %472 = vst [vmem:[#allocation2 + $0x18] sm:$0xff] (!%p2848_p4), %v468_v3 }
  0x11   : > { %s3575_s30 = scalar_lea.vmem %s4109_s3, %s3209_s23  ;;  %s2961_s15 = sshll.u32 %s3560_s19, 8 }
  0x12   : > { %s2962_s16 = sshll.u32 %s3560_s19, 7  ;;  %s3587_s22 = scalar_lea.vmem %s4112_s6, %s2961_s15 }
  0x13   : > { %s3592_s26 = scalar_lea.vmem %s4113_s7, %s2962_s16 }
  0x15 PF: > { %v3254_v10 = vld [vmem:[%s3575_s30 + $0x4] ss:$12 sps:$4 sm:$0xff]   ;;  %v3256_v11 = vld [vmem:[%s3575_s30] ss:$12 sps:$4 sm:$0xff]   ;;  %v3257_v14 = vld [vmem:[%s3575_s30 + $0x1c] ss:$12 sps:$4 sm:$0xff]   ;;  %s4120_s20 = scalar_lea.vmem %s4108_s2, %s3560_s19 }
  0x16   : > { %v3607_v4 = vld [vmem:[#allocation2] sm:$0xff]  ;;  %v3609_v5 = vld [vmem:[#allocation2 + $0x8] sm:$0xff]  ;;  %679 = vmatprep.subr.bf16.mxu0 %v3254_v10  ;;  %v3262_v17 = vld [vmem:[%s3575_s30 + $0x30] ss:$12 sps:$4 sm:$0xff]   ;;  %v3482_v26 = vmov 0   ;;  %v3483_v0 = vmov 0.0  }
  0x17   : > { %v3611_v6 = vld [vmem:[#allocation2 + $0x10] sm:$0xff]  ;;  %v478_v7 = vmul.f32 %v3607_v4, %v3607_v4  ;;  %v3617_v9 = vld [vmem:[#allocation2 + $0x18] sm:$0xff]  ;;  %v479_v12 = vmul.f32 %v3609_v5, %v3609_v5  ;;  %680 = vmatpush1.bf16.msra.mxu0 %v3256_v11  ;;  %v3268_v21 = vld [vmem:[%s3575_s30 + $0x60] ss:$12 sps:$4 sm:$0xff]   ;;  %711 = vmatprep.mubr.bf16.mxu0 %v3482_v26  ;;  %vm3484_vm0 = vmmov 0   ;;  %vm803_vm1 = vcmask 261120  }
  0x18   : > { %v480_v8 = vmul.f32 %v3611_v6, %v3611_v6  ;;  %v481_v13 = vmul.f32 %v3617_v9, %v3617_v9  ;;  %v3259_v15 = vld [vmem:[%s3575_s30 + $0x18] ss:$12 sps:$4 sm:$0xff]   ;;  %681 = vmatprep.subr.bf16.mxu0 %v3257_v14  ;;  %v3260_v16 = vld [vmem:[%s3575_s30 + $0x34] ss:$12 sps:$4 sm:$0xff]   ;;  %v3269_v22 = vld [vmem:[%s3575_s30 + $0x7c] ss:$12 sps:$4 sm:$0xff]  }
  0x19   : > { %482 = vadd.xlane.f32.xlu0 %v478_v7  ;;  %v3263_v18 = vld [vmem:[%s3575_s30 + $0x4c] ss:$12 sps:$4 sm:$0xff]   ;;  %v3265_v19 = vld [vmem:[%s3575_s30 + $0x48] ss:$12 sps:$4 sm:$0xff]   ;;  %v3266_v20 = vld [vmem:[%s3575_s30 + $0x64] ss:$12 sps:$4 sm:$0xff]  }
  0x1a   : > { %486 = vadd.xlane.f32.xlu1 %v480_v8  ;;  %v3271_v23 = vld [vmem:[%s3575_s30 + $0x78] ss:$12 sps:$4 sm:$0xff]   ;;  %v3272_v24 = vld [vmem:[%s3575_s30 + $0x94] ss:$12 sps:$4 sm:$0xff]   ;;  %v3274_v25 = vld [vmem:[%s3575_s30 + $0x90] ss:$12 sps:$4 sm:$0xff]  }
  0x1b   : > { %682 = vmatpush1.bf16.msra.mxu0 %v3259_v15  ;;  %v3275_v27 = vld [vmem:[%s3575_s30 + $0xac] ss:$12 sps:$4 sm:$0xff]   ;;  %v3277_v28 = vld [vmem:[%s3575_s30 + $0xa8] ss:$12 sps:$4 sm:$0xff]   ;;  %v3281_v32 = vld [vmem:[%s3575_s30 + $0x50] ss:$12 sps:$4 sm:$0xff]  }
  0x1c   : > { %683 = vmatprep.subr.bf16.mxu0 %v3260_v16  ;;  %v3278_v29 = vld [vmem:[%s3575_s30 + $0x8] ss:$12 sps:$4 sm:$0xff]   ;;  %v3279_v30 = vld [vmem:[%s3575_s30 + $0x20] ss:$12 sps:$4 sm:$0xff]   ;;  %v3280_v31 = vld [vmem:[%s3575_s30 + $0x38] ss:$12 sps:$4 sm:$0xff]  }
  0x1d   : > { %484 = vadd.xlane.f32.xlu0 %v479_v12  ;;  %3053 = vmatprep.subr.bf16.mxu1 %v3278_v29  ;;  %v3282_v33 = vld [vmem:[%s3575_s30 + $0x68] ss:$12 sps:$4 sm:$0xff]   ;;  %v3283_v34 = vld [vmem:[%s3575_s30 + $0x80] ss:$12 sps:$4 sm:$0xff]   ;;  %v3284_v35 = vld [vmem:[%s3575_s30 + $0x98] ss:$12 sps:$4 sm:$0xff]  }
  0x1e   : > { %488 = vadd.xlane.f32.xlu1 %v481_v13  ;;  %3054 = vmatpush3.bf16.msra.mxu1 %v3278_v29  ;;  %v3285_v36 = vld [vmem:[%s3575_s30 + $0xb0] ss:$12 sps:$4 sm:$0xff]   ;;  %v2849_v54 = vld [vmem:[%s4120_s20] ss:$0 sm:$0xff]  ;;  %vm906_vm2 = vcmask 130048   ;;  %s3485_s17 = smov 96  }
  0x1f   : > { %684 = vmatpush1.bf16.msra.mxu0 %v3262_v17  ;;  %3055 = vmatprep.subr.bf16.mxu1 %v3279_v30  ;;  %s3486_s24 = smov 64   ;;  %s3487_s25 = smov 32   ;;  %vm1849_vm3 = vcmask 523264   ;;  %vm1854_vm4 = vcmask 785408  }
  0x20   : > { %685 = vmatprep.subr.bf16.mxu0 %v3263_v18  ;;  %p2947_p5 = scmp.ne.s32.totalorder %s3554_s18, 1 }
  0x22   : > { %3056 = vmatpush3.bf16.msra.mxu1 %v3279_v30 }
  0x23   : > { %686 = vmatpush1.bf16.msra.mxu0 %v3265_v19  ;;  %3057 = vmatprep.subr.bf16.mxu1 %v3280_v31 }
  0x24   : > { %687 = vmatprep.subr.bf16.mxu0 %v3266_v20 }
  0x26   : > { %3058 = vmatpush3.bf16.msra.mxu1 %v3280_v31 }
  0x27   : > { %688 = vmatpush1.bf16.msra.mxu0 %v3268_v21  ;;  %3059 = vmatprep.subr.bf16.mxu1 %v3281_v32 }
  0x28   : > { %689 = vmatprep.subr.bf16.mxu0 %v3269_v22  ;;  %v787_v22 = vld [vmem:[%s4107_s1] sm:$0xff] }
  0x2a   : > { %3060 = vmatpush3.bf16.msra.mxu1 %v3281_v32 }
  0x2b   : > { %690 = vmatpush1.bf16.msra.mxu0 %v3271_v23  ;;  %3061 = vmatprep.subr.bf16.mxu1 %v3282_v33 }
  0x2c   : > { %691 = vmatprep.subr.bf16.mxu0 %v3272_v24 }
  0x2e   : > { %3062 = vmatpush3.bf16.msra.mxu1 %v3282_v33 }
  0x2f   : > { %692 = vmatpush1.bf16.msra.mxu0 %v3274_v25  ;;  %3063 = vmatprep.subr.bf16.mxu1 %v3283_v34 }
  0x30   : > { %693 = vmatprep.subr.bf16.mxu0 %v3275_v27  ;;  %v788_v27 = vld [vmem:[%s4107_s1 + $0x8] sm:$0xff] }
  0x32   : > { %3064 = vmatpush3.bf16.msra.mxu1 %v3283_v34 }
  0x33   : > { %694 = vmatpush1.bf16.msra.mxu0 %v3277_v28  ;;  %3065 = vmatprep.subr.bf16.mxu1 %v3284_v35 }
  0x34   : > { %3079 = vmatprep.subr.bf16.mxu0 %v3483_v0 }
  0x36   : > { %3066 = vmatpush3.bf16.msra.mxu1 %v3284_v35  ;;  %v789_v35 = vld [vmem:[%s4107_s1 + $0x10] sm:$0xff] }
  0x37   : > { %3067 = vmatprep.subr.bf16.mxu1 %v3285_v36 }
  0x3a   : > { %3068 = vmatpush3.bf16.msra.mxu1 %v3285_v36 }
  0x3b   : > { %3073 = vmatprep.subr.bf16.mxu1 %v3483_v0 }
  0xa6   : > { %v483_v37 = vpop.xlane.xlu0 %482 }
  0xa7   : > { %v487_v38 = vpop.xlane.xlu1 %486  ;;  %v491_v39 = vmul.f32 0.0078125, %v483_v37 }
  0xa8   : > { %v493_v40 = vmul.f32 0.0078125, %v487_v38 }
  0xa9   : > { %v495_v41 = vadd.f32 1e-06, %v491_v39  ;;  %v790_v39 = vld [vmem:[%s4107_s1 + $0x18] sm:$0xff] }
  0xaa   : > { %v497_v42 = vadd.f32 1e-06, %v493_v40  ;;  %v485_v43 = vpop.xlane.xlu0 %484 }
  0xab   : > { %v489_v44 = vpop.xlane.xlu1 %488  ;;  %3358 = vrsqrt.f32 %v495_v41  ;;  %v492_v45 = vmul.f32 0.0078125, %v485_v43 }
  0xac   : > { %v494_v46 = vmul.f32 0.0078125, %v489_v44  ;;  %3360 = vrsqrt.f32 %v497_v42 }
  0xad   : > { %v496_v47 = vadd.f32 1e-06, %v492_v45 }
  0xae   : > { %v498_v48 = vadd.f32 1e-06, %v494_v46 }
  0xaf   : > { %3362 = vrsqrt.f32 %v496_v47 }
  0xb0   : > { %3364 = vrsqrt.f32 %v498_v48 }
  0xb5   : > { %v3359_v49 = vpop.eup %3358 }
  0xb6   : > { %v3361_v50 = vpop.eup %3360  ;;  %v503_v52 = vmul.f32 %v3359_v49, %v3607_v4 }
  0xb7   : > { %v505_v51 = vmul.f32 %v3361_v50, %v3611_v6 }
  0xb8   : > { %v513_v59 = vmul.f32 %v2849_v54, %v503_v52 }
  0xb9   : > { %v3363_v53 = vpop.eup %3362  ;;  %v515_v58 = vmul.f32 %v2849_v54, %v505_v51 }
  0xba   : > { %v3365_v55 = vpop.eup %3364  ;;  %v504_v56 = vmul.f32 %v3363_v53, %v3609_v5 }
  0xbb   : > { %v506_v57 = vmul.f32 %v3365_v55, %v3617_v9 }
  0xbc   : > { %v514_v60 = vmul.f32 %v2849_v54, %v504_v56 }
  0xbd   : > { %v516_v61 = vmul.f32 %v2849_v54, %v506_v57 }
  0xbe   : > { %v517_v62 = vpack.c.bf16 %v514_v60, %v513_v59 }
  0xbf   : > { %v518_v63 = vpack.c.bf16 %v516_v61, %v515_v58 }
  0xc0   : > { %712 = vmatmul.mubr.bf16.vlgmr.msra.gmra.mrb[0].mxu0 %v517_v62  ;;  %3069 = vmatprep.mubr.bf16.mxu1 %v517_v62 }
  0xc1   : > { %721 = vmatprep.mubr.bf16.mxu0 %v3482_v26  ;;  %3070 = vmatmul.mubr.bf16.vlgmr.msra.gmra.mrb[0].mxu1 %v518_v63 }
  0xc2   : > { %3075 = vmatprep.mubr.msk.bf16.mxu1 %vm3484_vm0, %v3483_v0 }
  0xc8   : > { %722 = vmatmul.mubr.bf16.gmra.mrb[4].mxu0 %v518_v63 }
  0xc9   : > { %3081 = vmatprep.mubr.msk.bf16.mxu0 %vm3484_vm0, %v3483_v0 }
 0x193   : > { %v713_v1 = vpop.f32.mrb[0].mxu0 }
 0x194   : > { %v715_v2 = vpop.f32.mrb[1].mxu0  ;;  %v3071_v3 = vpop.f32.mrb[0].mxu1 }
 0x195   : > { %v717_v4 = vpop.f32.mrb[2].mxu0  ;;  %v766_v5 = vpop.f32.mrb[1].mxu1 }
 0x196   : > { %v3664_v6 = vpack.c.bf16 %v717_v4, %v713_v1  ;;  %v719_v7 = vpop.f32.mrb[3].mxu0  ;;  %v3072_v8 = vpop.f32.mrb[2].mxu1 }
 0x197   : > { %v3666_v9 = vpack.c.bf16 %v719_v7, %v715_v2  ;;  %v3668_v10 = vpack.c.bf16 %v3072_v8, %v3071_v3  ;;  %v769_v11 = vpop.f32.mrb[3].mxu1 }
 0x198   : > { %v3670_v12 = vpack.c.bf16 %v769_v11, %v766_v5 }
 0x199   : > { %v808_v13 = vsel %vm803_vm1, %v3666_v9, 0 }
 0x19a   : > { %3074 = vmatpush3.bf16.xpose.msra.mxu1 %v808_v13 }
 0x19b   : > { %v723_v14 = vpop.f32.mrb[4].mxu0  ;;  %3085 = vmatprep.subr.bf16.mxu1 %v3483_v0 }
 0x19c   : > { %v725_v15 = vpop.f32.mrb[5].mxu0 }
 0x19d   : > { %v727_v16 = vpop.f32.mrb[6].mxu0 }
 0x19e   : > { %v3675_v17 = vpack.c.bf16 %v727_v16, %v723_v14  ;;  %v729_v18 = vpop.f32.mrb[7].mxu0 }
 0x19f   : > { %v3677_v19 = vpack.c.bf16 %v729_v18, %v725_v15 }
 0x1a1   : > { %3076 = vmatmul.mubr.msk.bf16.vlgmr.msra.gmra.mrb[4].mxu1 %vm803_vm1, %v3664_v6  ;;  %v855_v20 = vsel %vm803_vm1, %v3677_v19, 0 }
 0x1a2   : > { %3080 = vmatpush3.bf16.xpose.msra.mxu0 %v855_v20  ;;  %3086 = vmatpush3.bf16.msra.mxu1 %v3670_v12 }
 0x1a3   : > { %3091 = vmatprep.subr.bf16.mxu0 %v3483_v0  ;;  %3087 = vmatprep.mubr.msk.bf16.mxu1 %vm3484_vm0, %v3483_v0 }
 0x1a4   : > { %3097 = vmatprep.subr.bf16.mxu1 %v3483_v0 }
 0x1a9   : > { %3082 = vmatmul.mubr.msk.bf16.vlgmr.msra.gmra.mrb[8].mxu0 %vm803_vm1, %v3675_v17 }
 0x1aa   : > { %3092 = vmatpush3.bf16.msra.mxu0 %v3668_v10  ;;  %3093 = vmatprep.mubr.msk.bf16.mxu0 %vm3484_vm0, %v3483_v0 }
 0x1ab   : > { %3103 = vmatprep.subr.bf16.mxu0 %v3483_v0 }
 0x274   : > { %v844_v21 = vpop.f32.mrb[4].mxu1 }
 0x275   : > { %v898_v23 = vmul.f32 0.17677669, %v844_v21  ;;  %v3077_v24 = vpop.f32.mrb[5].mxu1 }
 0x276   : > { %v847_v25 = vpop.f32.mrb[6].mxu1 }
 0x277   : > { %v899_v28 = vmul.f32 0.17677669, %v847_v25  ;;  %v3078_v29 = vpop.f32.mrb[7].mxu1  ;;  %v902_v30 = vadd.f32 %v898_v23, %v787_v22 }
 0x279   : > { %v907_v31 = vsel %vm906_vm2, %v902_v30, -inf  ;;  %v903_v32 = vadd.f32 %v899_v28, %v788_v27 }
 0x27a   : > { %908 = vmax.xlane.f32.xlu0 %v907_v31 }
 0x27b   : > { %v910_v33 = vsel %vm906_vm2, %v903_v32, -inf }
 0x27c   : > { %911 = vmax.xlane.f32.xlu1 %v910_v33  ;;  %v891_v34 = vpop.f32.mrb[8].mxu0 }
 0x27d   : > { %v900_v36 = vmul.f32 0.17677669, %v891_v34  ;;  %v3083_v37 = vpop.f32.mrb[9].mxu0 }
 0x27e   : > { %v894_v38 = vpop.f32.mrb[10].mxu0 }
 0x27f   : > { %v901_v40 = vmul.f32 0.17677669, %v894_v38  ;;  %v904_v41 = vadd.f32 %v900_v36, %v789_v35  ;;  %v3084_v42 = vpop.f32.mrb[11].mxu0  ;;  %v791_v35 = vld [vmem:[%s4107_s1 + $0x20] sm:$0xff] }
 0x281   : > { %v913_v43 = vsel %vm906_vm2, %v904_v41, -inf  ;;  %v905_v44 = vadd.f32 %v901_v40, %v790_v39  ;;  %v792_v39 = vld [vmem:[%s4107_s1 + $0x28] sm:$0xff] }
 0x282   : > { %914 = vmax.xlane.f32.xlu0 %v913_v43 }
 0x283   : > { %v916_v45 = vsel %vm906_vm2, %v905_v44, -inf }
 0x284   : > { %917 = vmax.xlane.f32.xlu1 %v916_v45 }
 0x307   : > { %v909_v46 = vpop.xlane.xlu0 %908 }
 0x308   : > { %v919_v47 = vsub.f32 %v902_v30, %v909_v46 }
 0x309   : > { %v912_v48 = vpop.xlane.xlu1 %911 }
 0x30a   : > { %v923_v49 = vmul.f32 1.442695, %v919_v47  ;;  %v920_v50 = vsub.f32 %v903_v32, %v912_v48 }
 0x30c   : > { %3366 = vpow2.f32 %v923_v49  ;;  %v925_v51 = vmul.f32 1.442695, %v920_v50 }
 0x30e   : > { %3368 = vpow2.f32 %v925_v51  ;;  %v793_v51 = vld [vmem:[%s4107_s1 + $0x30] sm:$0xff] }
 0x30f   : > { %v915_v52 = vpop.xlane.xlu0 %914 }
 0x310   : > { %v921_v53 = vsub.f32 %v904_v41, %v915_v52 }
 0x311   : > { %v918_v61 = vpop.xlane.xlu1 %917 }
 0x312   : > { %v927_v54 = vmul.f32 1.442695, %v921_v53  ;;  %v922_v62 = vsub.f32 %v905_v44, %v918_v61 }
 0x314   : > { %3370 = vpow2.f32 %v927_v54  ;;  %v929_v63 = vmul.f32 1.442695, %v922_v62 }
 0x316   : > { %v3367_v55 = vpop.eup %3366  ;;  %3372 = vpow2.f32 %v929_v63 }
 0x317   : > { %v931_v56 = vsel %vm906_vm2, %v3367_v55, 0.0 }
 0x318   : > { %v3369_v57 = vpop.eup %3368  ;;  %932 = vadd.xlane.f32.xlu0 %v931_v56 }
 0x319   : > { %v934_v58 = vsel %vm906_vm2, %v3369_v57, 0.0 }
 0x31a   : > { %935 = vadd.xlane.f32.xlu1 %v934_v58 }
 0x31e   : > { %v3371_v59 = vpop.eup %3370 }
 0x31f   : > { %v937_v60 = vsel %vm906_vm2, %v3371_v59, 0.0 }
 0x320   : > { %938 = vadd.xlane.f32.xlu0 %v937_v60  ;;  %v3373_v1 = vpop.eup %3372 }
 0x321   : > { %v940_v2 = vsel %vm906_vm2, %v3373_v1, 0.0 }
 0x32b   : > { %1098 = vrot.lane.b32.xlu1 %v3677_v19, %s3485_s17 }
 0x336   : > { %1045 = vrot.lane.b32.xlu0 %v3666_v9, %s3485_s17 }
 0x34f   : > { %941 = vadd.xlane.f32.xlu1 %v940_v2 }
 0x360   : > { %1042 = vrot.lane.b32.xlu1 %v3664_v6, %s3485_s17 }
 0x364   : > { %1095 = vrot.lane.b32.xlu1 %v3675_v17, %s3485_s17 }
 0x3a5   : > { %v933_v3 = vpop.xlane.xlu0 %932 }
 0x3a6   : > { %3374 = vrcp.f32 %v933_v3 }
 0x3a7   : > { %v936_v4 = vpop.xlane.xlu1 %935 }
 0x3a8   : > { %3376 = vrcp.f32 %v936_v4 }
 0x3ab   : > { %v1099_v18 = vpop.permute.xlu1 %1098 }
 0x3ac   : > { %v1104_v28 = vsel %vm803_vm1, %v1099_v18, 0 }
 0x3ad   : > { %v939_v5 = vpop.xlane.xlu0 %938 }
 0x3ae   : > { %3378 = vrcp.f32 %v939_v5 }
 0x3b0   : > { %v3375_v7 = vpop.eup %3374 }
 0x3b1   : > { %v947_v11 = vmul.f32 %v3375_v7, %v3367_v55  ;;  %v1046_v14 = vpop.permute.xlu0 %1045  ;;  %v794_v55 = vld [vmem:[%s4107_s1 + $0x38] sm:$0xff] }
 0x3b2   : > { %v3377_v8 = vpop.eup %3376  ;;  %v1051_v16 = vsel %vm803_vm1, %v1046_v14, 0 }
 0x3b3   : > { %v948_v13 = vmul.f32 %v3377_v8, %v3369_v57 }
 0x3b5   : > { %v951_v15 = vpack.c.bf16 %v948_v13, %v947_v11 }
 0x3b7   : > { %3088 = vmatmul.mubr.msk.bf16.vlgmr.msra.gmra.mrb[8].mxu1 %vm906_vm2, %v951_v15 }
 0x3b8   : > { %3098 = vmatpush3.bf16.xpose.msra.mxu1 %v1051_v16  ;;  %3099 = vmatprep.mubr.msk.bf16.mxu1 %vm3484_vm0, %v3483_v0  ;;  %v3379_v22 = vpop.eup %3378 }
 0x3b9   : > { %3109 = vmatprep.subr.bf16.mxu1 %v3483_v0  ;;  %v949_v24 = vmul.f32 %v3379_v22, %v3371_v59 }
 0x3dc   : > { %v942_v20 = vpop.xlane.xlu1 %941 }
 0x3dd   : > { %3380 = vrcp.f32 %v942_v20 }
 0x3e0   : > { %v1043_v21 = vpop.permute.xlu1 %1042 }
 0x3e1   : > { %3100 = vmatmul.mubr.msk.bf16.vlgmr.msra.gmra.mrb[12].mxu1 %vm803_vm1, %v1043_v21 }
 0x3e2   : > { %3111 = vmatprep.mubr.msk.bf16.mxu1 %vm3484_vm0, %v3483_v0 }
 0x3e4   : > { %v1096_v29 = vpop.permute.xlu1 %1095 }
 0x3e7   : > { %v3381_v23 = vpop.eup %3380 }
 0x3e8   : > { %v950_v25 = vmul.f32 %v3381_v23, %v3373_v1 }
 0x3ea   : > { %v952_v27 = vpack.c.bf16 %v950_v25, %v949_v24 }
 0x3ec   : > { %3094 = vmatmul.mubr.msk.bf16.vlgmr.msra.gmra.mrb[12].mxu0 %vm906_vm2, %v952_v27 }
 0x3ed   : > { %3104 = vmatpush3.bf16.xpose.msra.mxu0 %v1104_v28  ;;  %3105 = vmatprep.mubr.msk.bf16.mxu0 %vm3484_vm0, %v3483_v0 }
 0x3ee   : > { %3115 = vmatprep.subr.bf16.mxu0 %v3483_v0 }
 0x3f4   : > { %3106 = vmatmul.mubr.msk.bf16.vlgmr.msra.gmra.mrb[16].mxu0 %vm803_vm1, %v1096_v29 }
 0x3f5   : > { %3117 = vmatprep.mubr.msk.bf16.mxu0 %vm3484_vm0, %v3483_v0 }
 0x48a   : > { %v3738_v30 = vpop.f32.mrb[8].mxu1 }
 0x48b   : > { %v3089_v31 = vpop.f32.mrb[9].mxu1 }
 0x48c   : > { %v3740_v32 = vpop.f32.mrb[10].mxu1 }
 0x48d   : > { %v3090_v33 = vpop.f32.mrb[11].mxu1 }
 0x4b4   : > { %v1087_v34 = vpop.f32.mrb[12].mxu1 }
 0x4b5   : > { %v1147_v36 = vmul.f32 0.17677669, %v1087_v34  ;;  %v3101_v37 = vpop.f32.mrb[13].mxu1 }
 0x4b6   : > { %v1090_v38 = vpop.f32.mrb[14].mxu1 }
 0x4b7   : > { %v1148_v40 = vmul.f32 0.17677669, %v1090_v38  ;;  %v3102_v41 = vpop.f32.mrb[15].mxu1  ;;  %v1151_v42 = vadd.f32 %v1147_v36, %v791_v35 }
 0x4b9   : > { %v1155_v43 = vsel %vm906_vm2, %v1151_v42, -inf  ;;  %v1152_v44 = vadd.f32 %v1148_v40, %v792_v39 }
 0x4ba   : > { %1156 = vmax.xlane.f32.xlu0 %v1155_v43 }
 0x4bb   : > { %v1158_v45 = vsel %vm906_vm2, %v1152_v44, -inf }
 0x4bc   : > { %1159 = vmax.xlane.f32.xlu1 %v1158_v45 }
 0x4bf   : > { %v3750_v46 = vpop.f32.mrb[12].mxu0 }
 0x4c0   : > { %v3095_v47 = vpop.f32.mrb[13].mxu0 }
 0x4c1   : > { %v3752_v48 = vpop.f32.mrb[14].mxu0 }
 0x4c2   : > { %v3096_v49 = vpop.f32.mrb[15].mxu0 }
 0x4c7   : > { %v1140_v50 = vpop.f32.mrb[16].mxu0 }
 0x4c8   : > { %v1149_v52 = vmul.f32 0.17677669, %v1140_v50  ;;  %v3107_v53 = vpop.f32.mrb[17].mxu0 }
 0x4c9   : > { %v1143_v54 = vpop.f32.mrb[18].mxu0 }
 0x4ca   : > { %v1150_v56 = vmul.f32 0.17677669, %v1143_v54  ;;  %v3108_v57 = vpop.f32.mrb[19].mxu0  ;;  %v1153_v58 = vadd.f32 %v1149_v52, %v793_v51 }
 0x4cc   : > { %v1161_v59 = vsel %vm906_vm2, %v1153_v58, -inf  ;;  %v1154_v60 = vadd.f32 %v1150_v56, %v794_v55 }
 0x4cd   : > { %1162 = vmax.xlane.f32.xlu0 %v1161_v59 }
 0x4ce   : > { %v1164_v61 = vsel %vm906_vm2, %v1154_v60, -inf }
 0x4d1   : > { %1165 = vmax.xlane.f32.xlu0 %v1164_v61 }
 0x547   : > { %v1157_v62 = vpop.xlane.xlu0 %1156 }
 0x548   : > { %v1167_v63 = vsub.f32 %v1151_v42, %v1157_v62  ;;  %v796_v62 = vld [vmem:[%s4107_s1 + $0x48] sm:$0xff] }
 0x549   : > { %v1160_v1 = vpop.xlane.xlu1 %1159 }
 0x54a   : > { %v1171_v2 = vmul.f32 1.442695, %v1167_v63  ;;  %v1168_v3 = vsub.f32 %v1152_v44, %v1160_v1 }
 0x54c   : > { %3382 = vpow2.f32 %v1171_v2  ;;  %v1173_v4 = vmul.f32 1.442695, %v1168_v3 }
 0x54e   : > { %3384 = vpow2.f32 %v1173_v4 }
 0x556   : > { %v3383_v5 = vpop.eup %3382 }
 0x557   : > { %v1179_v7 = vsel %vm906_vm2, %v3383_v5, 0.0 }
 0x558   : > { %v3385_v8 = vpop.eup %3384  ;;  %1180 = vadd.xlane.f32.xlu0 %v1179_v7 }
 0x559   : > { %v1182_v11 = vsel %vm906_vm2, %v3385_v8, 0.0 }
 0x55a   : > { %1183 = vadd.xlane.f32.xlu1 %v1182_v11  ;;  %v1163_v13 = vpop.xlane.xlu0 %1162 }
 0x55b   : > { %v1169_v14 = vsub.f32 %v1153_v58, %v1163_v13  ;;  %v795_v58 = vld [vmem:[%s4107_s1 + $0x40] sm:$0xff] }
 0x55d   : > { %v1175_v15 = vmul.f32 1.442695, %v1169_v14 }
 0x55e   : > { %v1166_v20 = vpop.xlane.xlu0 %1165 }
 0x55f   : > { %3386 = vpow2.f32 %v1175_v15  ;;  %v1170_v21 = vsub.f32 %v1154_v60, %v1166_v20 }
 0x561   : > { %v1177_v22 = vmul.f32 1.442695, %v1170_v21 }
 0x563   : > { %3388 = vpow2.f32 %v1177_v22  ;;  %v798_v22 = vld [vmem:[%s4107_s1 + $0x58] sm:$0xff] }
 0x569   : > { %v3387_v16 = vpop.eup %3386 }
 0x56a   : > { %v1185_v18 = vsel %vm906_vm2, %v3387_v16, 0.0 }
 0x56b   : > { %1250 = vrot.lane.b32.xlu1 %v3668_v10, %s3485_s17  ;;  %1186 = vadd.xlane.f32.xlu0 %v1185_v18 }
 0x56d   : > { %v3389_v23 = vpop.eup %3388 }
 0x56e   : > { %v1188_v24 = vsel %vm906_vm2, %v3389_v23, 0.0 }
 0x56f   : > { %1299 = vrot.lane.b32.xlu1 %v3666_v9, %s3486_s24 }
 0x581   : > { %1202 = vrot.lane.b32.xlu0 %v3670_v12, %s3485_s17 }
 0x585   : > { %1297 = vrot.lane.b32.xlu0 %v3664_v6, %s3486_s24 }
 0x593   : > { %1189 = vadd.xlane.f32.xlu1 %v1188_v24 }
 0x5a4   : > { %1350 = vrot.lane.b32.xlu1 %v3677_v19, %s3486_s24 }
 0x5a8   : > { %1348 = vrot.lane.b32.xlu1 %v3675_v17, %s3486_s24 }
 0x5e5   : > { %v1181_v28 = vpop.xlane.xlu0 %1180 }
 0x5e7   : > { %v1184_v25 = vpop.xlane.xlu1 %1183 }
 0x5e8   : > { %3390 = vrcp.f32 %v1184_v25 }
 0x5e9   : > { %3392 = vrcp.f32 %v1181_v28 }
 0x5eb   : > { %v1251_v27 = vpop.permute.xlu1 %1250 }
 0x5ec   : > { %3116 = vmatpush3.bf16.msra.mxu0 %v1251_v27 }
 0x5ed   : > { %3127 = vmatprep.subr.bf16.mxu0 %v3483_v0 }
 0x5ef   : > { %v1300_v38 = vpop.permute.xlu1 %1299 }
 0x5f0   : > { %v1305_v39 = vsel %vm803_vm1, %v1300_v38, 0 }
 0x5f2   : > { %v3391_v29 = vpop.eup %3390 }
 0x5f3   : > { %v3393_v33 = vpop.eup %3392  ;;  %v1196_v34 = vmul.f32 %v3391_v29, %v3385_v8 }
 0x5f4   : > { %v1195_v35 = vmul.f32 %v3393_v33, %v3383_v5 }
 0x5f6   : > { %v1199_v37 = vpack.c.bf16 %v1196_v34, %v1195_v35 }
 0x5f8   : > { %v1187_v31 = vpop.xlane.xlu0 %1186 }
 0x5f9   : > { %3394 = vrcp.f32 %v1187_v31 }
 0x5fc   : > { %v1203_v36 = vpop.permute.xlu0 %1202 }
 0x5fd   : > { %3110 = vmatpush3.bf16.msra.mxu1 %v1203_v36 }
 0x5fe   : > { %3121 = vmatprep.subr.bf16.mxu1 %v3483_v0 }
 0x600   : > { %3112 = vmatmul.mubr.msk.bf16.vlgmr.msra.gmra.mrb[16].mxu1 %vm906_vm2, %v1199_v37  ;;  %v1298_v40 = vpop.permute.xlu0 %1297 }
 0x601   : > { %3123 = vmatprep.mubr.msk.bf16.mxu1 %vm3484_vm0, %v3483_v0 }
 0x603   : > { %v3395_v42 = vpop.eup %3394 }
 0x604   : > { %v1197_v44 = vmul.f32 %v3395_v42, %v3387_v16  ;;  %v797_v16 = vld [vmem:[%s4107_s1 + $0x50] sm:$0xff] }
 0x606   : > { %3122 = vmatpush3.bf16.xpose.msra.mxu1 %v1305_v39 }
 0x607   : > { %3133 = vmatprep.subr.bf16.mxu1 %v3483_v0 }
 0x60d   : > { %3124 = vmatmul.mubr.msk.bf16.vlgmr.msra.gmra.mrb[20].mxu1 %vm803_vm1, %v1298_v40 }
 0x60e   : > { %3135 = vmatprep.mubr.msk.bf16.mxu1 %vm3484_vm0, %v3483_v0 }
 0x620   : > { %v1190_v41 = vpop.xlane.xlu1 %1189 }
 0x621   : > { %3396 = vrcp.f32 %v1190_v41 }
 0x624   : > { %v1351_v47 = vpop.permute.xlu1 %1350 }
 0x625   : > { %v1356_v50 = vsel %vm803_vm1, %v1351_v47, 0 }
 0x628   : > { %v1349_v51 = vpop.permute.xlu1 %1348 }
 0x62b   : > { %v3397_v43 = vpop.eup %3396 }
 0x62c   : > { %v1198_v45 = vmul.f32 %v3397_v43, %v3389_v23 }
 0x62e   : > { %v1200_v49 = vpack.c.bf16 %v1198_v45, %v1197_v44 }
 0x630   : > { %3118 = vmatmul.mubr.msk.bf16.vlgmr.msra.gmra.mrb[20].mxu0 %vm906_vm2, %v1200_v49 }
 0x631   : > { %3128 = vmatpush3.bf16.xpose.msra.mxu0 %v1356_v50  ;;  %3129 = vmatprep.mubr.msk.bf16.mxu0 %vm3484_vm0, %v3483_v0 }
 0x632   : > { %3139 = vmatprep.subr.bf16.mxu0 %v3483_v0 }
 0x638   : > { %3130 = vmatmul.mubr.msk.bf16.vlgmr.msra.gmra.mrb[24].mxu0 %vm803_vm1, %v1349_v51 }
 0x639   : > { %3141 = vmatprep.mubr.msk.bf16.mxu0 %vm3484_vm0, %v3483_v0 }
 0x6d3   : > { %v3796_v52 = vpop.f32.mrb[16].mxu1 }
 0x6d4   : > { %v3113_v53 = vpop.f32.mrb[17].mxu1 }
 0x6d5   : > { %v3798_v54 = vpop.f32.mrb[18].mxu1 }
 0x6d6   : > { %v3224_v55 = vpack.i.bf16 %v3798_v54, %v3796_v52  ;;  %v3114_v56 = vpop.f32.mrb[19].mxu1 }
 0x6e0   : > { %v1341_v57 = vpop.f32.mrb[20].mxu1 }
 0x6e1   : > { %v1399_v59 = vmul.f32 0.17677669, %v1341_v57  ;;  %v3125_v60 = vpop.f32.mrb[21].mxu1 }
 0x6e2   : > { %v1344_v61 = vpop.f32.mrb[22].mxu1 }
 0x6e3   : > { %v1400_v63 = vmul.f32 0.17677669, %v1344_v61  ;;  %v3126_v1 = vpop.f32.mrb[23].mxu1  ;;  %v1403_v2 = vadd.f32 %v1399_v59, %v795_v58 }
 0x6e5   : > { %v1407_v3 = vsel %vm906_vm2, %v1403_v2, -inf  ;;  %v1404_v4 = vadd.f32 %v1400_v63, %v796_v62 }
 0x6e6   : > { %1408 = vmax.xlane.f32.xlu0 %v1407_v3 }
 0x6e7   : > { %v1410_v5 = vsel %vm906_vm2, %v1404_v4, -inf }
 0x6e8   : > { %1411 = vmax.xlane.f32.xlu1 %v1410_v5 }
 0x703   : > { %v3810_v7 = vpop.f32.mrb[20].mxu0 }
 0x704   : > { %v3119_v8 = vpop.f32.mrb[21].mxu0 }
 0x705   : > { %v3812_v11 = vpop.f32.mrb[22].mxu0 }
 0x706   : > { %v3229_v13 = vpack.i.bf16 %v3812_v11, %v3810_v7  ;;  %v3120_v14 = vpop.f32.mrb[23].mxu0 }
 0x70b   : > { %v1392_v15 = vpop.f32.mrb[24].mxu0 }
 0x70c   : > { %v1401_v18 = vmul.f32 0.17677669, %v1392_v15  ;;  %v3131_v20 = vpop.f32.mrb[25].mxu0 }
 0x70d   : > { %v1395_v21 = vpop.f32.mrb[26].mxu0 }
 0x70e   : > { %v1402_v23 = vmul.f32 0.17677669, %v1395_v21  ;;  %v3132_v24 = vpop.f32.mrb[27].mxu0  ;;  %v1405_v25 = vadd.f32 %v1401_v18, %v797_v16 }
 0x710   : > { %v1413_v27 = vsel %vm906_vm2, %v1405_v25, -inf  ;;  %v1406_v28 = vadd.f32 %v1402_v23, %v798_v22 }
 0x711   : > { %1414 = vmax.xlane.f32.xlu0 %v1413_v27 }
 0x712   : > { %v1416_v29 = vsel %vm906_vm2, %v1406_v28, -inf }
 0x715   : > { %1417 = vmax.xlane.f32.xlu0 %v1416_v29 }
 0x773   : > { %v1409_v31 = vpop.xlane.xlu0 %1408 }
 0x774   : > { %v1419_v33 = vsub.f32 %v1403_v2, %v1409_v31 }
 0x775   : > { %v1412_v34 = vpop.xlane.xlu1 %1411 }
 0x776   : > { %v1423_v35 = vmul.f32 1.442695, %v1419_v33  ;;  %v1420_v36 = vsub.f32 %v1404_v4, %v1412_v34 }
 0x778   : > { %3398 = vpow2.f32 %v1423_v35  ;;  %v1425_v37 = vmul.f32 1.442695, %v1420_v36 }
 0x77a   : > { %3400 = vpow2.f32 %v1425_v37 }
 0x782   : > { %v3399_v38 = vpop.eup %3398 }
 0x783   : > { %v1431_v39 = vsel %vm906_vm2, %v3399_v38, 0.0 }
 0x784   : > { %v3401_v40 = vpop.eup %3400  ;;  %1432 = vadd.xlane.f32.xlu0 %v1431_v39 }
 0x785   : > { %v1434_v41 = vsel %vm906_vm2, %v3401_v40, 0.0 }
 0x786   : > { %1435 = vadd.xlane.f32.xlu1 %v1434_v41 }
 0x797   : > { %1500 = vrot.lane.b32.xlu1 %v3668_v10, %s3486_s24 }
 0x79b   : > { %1549 = vrot.lane.b32.xlu1 %v3666_v9, %s3487_s25 }
 0x79e   : > { %v1415_v42 = vpop.xlane.xlu0 %1414 }
 0x79f   : > { %v1421_v43 = vsub.f32 %v1405_v25, %v1415_v42 }
 0x7a1   : > { %v1427_v44 = vmul.f32 1.442695, %v1421_v43 }
 0x7a2   : > { %v1418_v45 = vpop.xlane.xlu0 %1417 }
 0x7a3   : > { %3402 = vpow2.f32 %v1427_v44  ;;  %v1422_v47 = vsub.f32 %v1406_v28, %v1418_v45  ;;  %v799_v28 = vld [vmem:[%s4107_s1 + $0x60] sm:$0xff] }
 0x7a5   : > { %v1429_v50 = vmul.f32 1.442695, %v1422_v47  ;;  %v801_v47 = vld [vmem:[%s4107_s1 + $0x70] sm:$0xff] }
 0x7a7   : > { %3404 = vpow2.f32 %v1429_v50 }
 0x7ad   : > { %v3403_v49 = vpop.eup %3402 }
 0x7ae   : > { %v1437_v51 = vsel %vm906_vm2, %v3403_v49, 0.0 }
 0x7af   : > { %1438 = vadd.xlane.f32.xlu0 %v1437_v51 }
 0x7b1   : > { %v3405_v53 = vpop.eup %3404 }
 0x7b2   : > { %v1440_v56 = vsel %vm906_vm2, %v3405_v53, 0.0 }
 0x7bf   : > { %1441 = vadd.xlane.f32.xlu1 %v1440_v56 }
 0x7c5   : > { %1453 = vrot.lane.b32.xlu0 %v3670_v12, %s3486_s24 }
 0x7c9   : > { %1547 = vrot.lane.b32.xlu0 %v3664_v6, %s3487_s25 }
 0x7d0   : > { %1600 = vrot.lane.b32.xlu1 %v3677_v19, %s3487_s25 }
 0x7d4   : > { %1598 = vrot.lane.b32.xlu1 %v3675_v17, %s3487_s25 }
 0x811   : > { %v1433_v58 = vpop.xlane.xlu0 %1432 }
 0x813   : > { %v1436_v9 = vpop.xlane.xlu1 %1435 }
 0x814   : > { %3406 = vrcp.f32 %v1436_v9 }
 0x815   : > { %3408 = vrcp.f32 %v1433_v58 }
 0x817   : > { %v1501_v57 = vpop.permute.xlu1 %1500 }
 0x818   : > { %3140 = vmatpush3.bf16.msra.mxu0 %v1501_v57 }
 0x819   : > { %3151 = vmatprep.subr.bf16.mxu0 %v3483_v0 }
 0x81b   : > { %v1550_v17 = vpop.permute.xlu1 %1549 }
 0x81c   : > { %v1555_v19 = vsel %vm803_vm1, %v1550_v17, 0 }
 0x81e   : > { %v3407_v59 = vpop.eup %3406 }
 0x81f   : > { %v3409_v61 = vpop.eup %3408  ;;  %v1448_v62 = vmul.f32 %v3407_v59, %v3401_v40 }
 0x820   : > { %v1447_v63 = vmul.f32 %v3409_v61, %v3399_v38 }
 0x822   : > { %v1451_v1 = vpack.c.bf16 %v1448_v62, %v1447_v63 }
 0x83c   : > { %v1439_v60 = vpop.xlane.xlu0 %1438 }
 0x83d   : > { %3410 = vrcp.f32 %v1439_v60 }
 0x840   : > { %v1454_v6 = vpop.permute.xlu0 %1453 }
 0x841   : > { %3134 = vmatpush3.bf16.msra.mxu1 %v1454_v6 }
 0x842   : > { %3145 = vmatprep.subr.bf16.mxu1 %v3483_v0 }
 0x844   : > { %3136 = vmatmul.mubr.msk.bf16.vlgmr.msra.gmra.mrb[24].mxu1 %vm906_vm2, %v1451_v1  ;;  %v1548_v3 = vpop.permute.xlu0 %1547 }
 0x845   : > { %3147 = vmatprep.mubr.msk.bf16.mxu1 %vm3484_vm0, %v3483_v0 }
 0x847   : > { %v3411_v4 = vpop.eup %3410 }
 0x848   : > { %v1449_v8 = vmul.f32 %v3411_v4, %v3403_v49 }
 0x84a   : > { %3146 = vmatpush3.bf16.xpose.msra.mxu1 %v1555_v19 }
 0x84b   : > { %3157 = vmatprep.subr.bf16.mxu1 %v3483_v0 }
 0x84c   : > { %v1442_v2 = vpop.xlane.xlu1 %1441 }
 0x84d   : > { %3412 = vrcp.f32 %v1442_v2 }
 0x850   : > { %v1601_v15 = vpop.permute.xlu1 %1600 }
 0x851   : > { %3148 = vmatmul.mubr.msk.bf16.vlgmr.msra.gmra.mrb[28].mxu1 %vm803_vm1, %v1548_v3  ;;  %v1606_v18 = vsel %vm803_vm1, %v1601_v15, 0 }
 0x852   : > { %3159 = vmatprep.mubr.msk.bf16.mxu1 %vm3484_vm0, %v3483_v0 }
 0x854   : > { %v1599_v20 = vpop.permute.xlu1 %1598 }
 0x857   : > { %v3413_v5 = vpop.eup %3412 }
 0x858   : > { %v1450_v14 = vmul.f32 %v3413_v5, %v3405_v53  ;;  %v802_v53 = vld [vmem:[%s4107_s1 + $0x78] sm:$0xff] }
 0x85a   : > { %v1452_v16 = vpack.c.bf16 %v1450_v14, %v1449_v8 }
 0x85c   : > { %3142 = vmatmul.mubr.msk.bf16.vlgmr.msra.gmra.mrb[28].mxu0 %vm906_vm2, %v1452_v16 }
 0x85d   : > { %3152 = vmatpush3.bf16.xpose.msra.mxu0 %v1606_v18  ;;  %3153 = vmatprep.mubr.msk.bf16.mxu0 %vm3484_vm0, %v3483_v0 }
 0x85e   : > { %3163 = vmatprep.subr.bf16.mxu0 %v3483_v0 }
 0x864   : > { %3154 = vmatmul.mubr.msk.bf16.vlgmr.msra.gmra.mrb[32].mxu0 %vm803_vm1, %v1599_v20 }
 0x865   : > { %3165 = vmatprep.mubr.msk.bf16.mxu0 %vm3484_vm0, %v3483_v0  ;;  %v800_v0 = vld [vmem:[%s4107_s1 + $0x68] sm:$0xff] }
 0x917   : > { %v3858_v21 = vpop.f32.mrb[24].mxu1 }
 0x918   : > { %v3137_v22 = vpop.f32.mrb[25].mxu1 }
 0x919   : > { %v3860_v23 = vpop.f32.mrb[26].mxu1 }
 0x91a   : > { %v3234_v24 = vpack.i.bf16 %v3860_v23, %v3858_v21  ;;  %v3138_v25 = vpop.f32.mrb[27].mxu1 }
 0x924   : > { %v1591_v27 = vpop.f32.mrb[28].mxu1 }
 0x925   : > { %v1649_v29 = vmul.f32 0.17677669, %v1591_v27  ;;  %v3149_v31 = vpop.f32.mrb[29].mxu1 }
 0x926   : > { %v1594_v33 = vpop.f32.mrb[30].mxu1 }
 0x927   : > { %v1650_v34 = vmul.f32 0.17677669, %v1594_v33  ;;  %v3150_v35 = vpop.f32.mrb[31].mxu1  ;;  %v1653_v36 = vadd.f32 %v1649_v29, %v799_v28 }
 0x928   : > { %v3287_v35 = vld [vmem:[%s3580_s14 + $0x8] sm:$0xff]  }
 0x929   : > { %v1657_v37 = vsel %vm906_vm2, %v1653_v36, -inf  ;;  %v1654_v38 = vadd.f32 %v1650_v34, %v800_v0  ;;  %v3286_v34 = vld [vmem:[%s3580_s14] sm:$0xff]  }
 0x92a   : > { %1658 = vmax.xlane.f32.xlu0 %v1657_v37  ;;  %v3289_v37 = vld [vmem:[%s3580_s14 + $0x18] sm:$0xff]  }
 0x92b   : > { %v1660_v39 = vsel %vm906_vm2, %v1654_v38, -inf }
 0x92c   : > { %1661 = vmax.xlane.f32.xlu1 %v1660_v39  ;;  %v3291_v39 = vld [vmem:[%s3580_s14 + $0x28] sm:$0xff]  }
 0x92f   : > { %v1540_v40 = vpop.f32.mrb[28].mxu0 }
 0x930   : > { %v3143_v41 = vpop.f32.mrb[29].mxu0 }
 0x931   : > { %v1543_v42 = vpop.f32.mrb[30].mxu0 }
 0x932   : > { %v3239_v43 = vpack.i.bf16 %v1543_v42, %v1540_v40  ;;  %v3144_v44 = vpop.f32.mrb[31].mxu0  ;;  %v3292_v40 = vld [vmem:[%s3580_s14 + $0x30] sm:$0xff]  }
 0x937   : > { %v1642_v45 = vpop.f32.mrb[32].mxu0 }
 0x938   : > { %v1651_v49 = vmul.f32 0.17677669, %v1642_v45  ;;  %v3155_v50 = vpop.f32.mrb[33].mxu0 }
 0x939   : > { %v1645_v51 = vpop.f32.mrb[34].mxu0 }
 0x93a   : > { %v1652_v56 = vmul.f32 0.17677669, %v1645_v51  ;;  %v3156_v9 = vpop.f32.mrb[35].mxu0  ;;  %v1655_v57 = vadd.f32 %v1651_v49, %v801_v47  ;;  %v3293_v47 = vld [vmem:[%s3580_s14 + $0x38] sm:$0xff]  }
 0x93c   : > { %v1663_v58 = vsel %vm906_vm2, %v1655_v57, -inf  ;;  %v1656_v59 = vadd.f32 %v1652_v56, %v802_v53 }
 0x93d   : > { %1664 = vmax.xlane.f32.xlu0 %v1663_v58 }
 0x93e   : > { %v1666_v60 = vsel %vm906_vm2, %v1656_v59, -inf }
 0x941   : > { %1667 = vmax.xlane.f32.xlu0 %v1666_v60 }
 0x9b7   : > { %v1659_v61 = vpop.xlane.xlu0 %1658 }
 0x9b8   : > { %v1669_v62 = vsub.f32 %v1653_v36, %v1659_v61  ;;  %v3288_v36 = vld [vmem:[%s3580_s14 + $0x10] sm:$0xff]  }
 0x9b9   : > { %v1662_v63 = vpop.xlane.xlu1 %1661 }
 0x9ba   : > { %v1673_v6 = vmul.f32 1.442695, %v1669_v62  ;;  %v1670_v1 = vsub.f32 %v1654_v38, %v1662_v63  ;;  %v3290_v38 = vld [vmem:[%s3580_s14 + $0x20] sm:$0xff]  }
 0x9bc   : > { %3414 = vpow2.f32 %v1673_v6  ;;  %v1675_v17 = vmul.f32 1.442695, %v1670_v1 }
 0x9be   : > { %3416 = vpow2.f32 %v1675_v17 }
 0x9c6   : > { %v3415_v19 = vpop.eup %3414 }
 0x9c7   : > { %v1681_v2 = vsel %vm906_vm2, %v3415_v19, 0.0 }
 0x9c8   : > { %v3417_v3 = vpop.eup %3416  ;;  %1682 = vadd.xlane.f32.xlu0 %v1681_v2 }
 0x9c9   : > { %v1684_v4 = vsel %vm906_vm2, %v3417_v3, 0.0 }
 0x9ca   : > { %1685 = vadd.xlane.f32.xlu1 %v1684_v4  ;;  %v1665_v5 = vpop.xlane.xlu0 %1664 }
 0x9cb   : > { %v1671_v8 = vsub.f32 %v1655_v57, %v1665_v5 }
 0x9cd   : > { %v1677_v14 = vmul.f32 1.442695, %v1671_v8 }
 0x9ce   : > { %v1668_v15 = vpop.xlane.xlu0 %1667 }
 0x9cf   : > { %3418 = vpow2.f32 %v1677_v14  ;;  %v1672_v16 = vsub.f32 %v1656_v59, %v1668_v15 }
 0x9d1   : > { %v1679_v18 = vmul.f32 1.442695, %v1672_v16 }
 0x9d3   : > { %3420 = vpow2.f32 %v1679_v18 }
 0x9d9   : > { %v3419_v20 = vpop.eup %3418 }
 0x9da   : > { %v1687_v22 = vsel %vm906_vm2, %v3419_v20, 0.0 }
 0x9db   : > { %1688 = vadd.xlane.f32.xlu0 %v1687_v22 }
 0x9dd   : > { %v3421_v25 = vpop.eup %3420 }
 0x9de   : > { %v1690_v27 = vsel %vm906_vm2, %v3421_v25, 0.0 }
 0x9df   : > { %1691 = vadd.xlane.f32.xlu1 %v1690_v27 }
 0x9f0   : > { %1750 = vrot.lane.b32.xlu1 %v3668_v10, %s3487_s25 }
 0x9f1   : > { %1703 = vrot.lane.b32.xlu0 %v3670_v12, %s3487_s25 }
 0x9f4   : > { %3225 = vrot.lane.b32.xlu1 %v3224_v55, %s3487_s25 }
 0x9f5   : > { %3235 = vrot.lane.b32.xlu0 %v3234_v24, %s3486_s24 }
 0x9f8   : > { %3230 = vrot.lane.b32.xlu1 %v3229_v13, %s3487_s25 }
 0x9fc   : > { %3240 = vrot.lane.b32.xlu1 %v3239_v43, %s3486_s24 }
 0xa55   : > { %v1683_v28 = vpop.xlane.xlu0 %1682 }
 0xa57   : > { %v1686_v10 = vpop.xlane.xlu1 %1685 }
 0xa58   : > { %3422 = vrcp.f32 %v1686_v10 }
 0xa59   : > { %3424 = vrcp.f32 %v1683_v28 }
 0xa62   : > { %v3423_v12 = vpop.eup %3422 }
 0xa63   : > { %v3425_v52 = vpop.eup %3424  ;;  %v1698_v54 = vmul.f32 %v3423_v12, %v3417_v3 }
 0xa64   : > { %v1697_v55 = vmul.f32 %v3425_v52, %v3415_v19 }
 0xa66   : > { %v1701_v7 = vpack.c.bf16 %v1698_v54, %v1697_v55  ;;  %v3297_v54 = vld [vmem:[%s3587_s22 + $0x8] ss:$16 sps:$4 sm:$0xff]   ;;  %v3299_v55 = vld [vmem:[%s3587_s22 + $0xc] ss:$16 sps:$4 sm:$0xff]  }
 0xa68   : > { %v1689_v29 = vpop.xlane.xlu0 %1688 }
 0xa69   : > { %3426 = vrcp.f32 %v1689_v29 }
 0xa6c   : > { %v1692_v21 = vpop.xlane.xlu1 %1691  ;;  %v1704_v23 = vpop.permute.xlu0 %1703 }
 0xa6d   : > { %3428 = vrcp.f32 %v1692_v21  ;;  %3158 = vmatpush3.bf16.msra.mxu1 %v1704_v23  ;;  %v3302_v21 = vld [vmem:[%s3587_s22 + $0x24] ss:$16 sps:$4 sm:$0xff]   ;;  %v3305_v23 = vld [vmem:[%s3587_s22 + $0x2c] ss:$16 sps:$4 sm:$0xff]  }
 0xa6e   : > { %3169 = vmatprep.subr.bf16.mxu1 %v3286_v34 }
 0xa70   : > { %v1751_v11 = vpop.permute.xlu1 %1750  ;;  %3160 = vmatmul.mubr.msk.bf16.vlgmr.msra.gmra.mrb[32].mxu1 %vm906_vm2, %v1701_v7  ;;  %v3236_v59 = vpop.permute.xlu0 %3235  ;;  %v3300_v7 = vld [vmem:[%s3587_s22 + $0x20] ss:$16 sps:$4 sm:$0xff]  }
 0xa71   : > { %3164 = vmatpush3.bf16.msra.mxu0 %v1751_v11  ;;  %3170 = vmatpush3.bf16.msra.mxu1 %v3286_v34  ;;  %v3238_v62 = vunpack.i.h.bf16 %v3236_v59  ;;  %v3237_v63 = vunpack.i.l.bf16 %v3236_v59  ;;  %v3303_v11 = vld [vmem:[%s3587_s22 + $0x28] ss:$16 sps:$4 sm:$0xff]   ;;  %v3318_v59 = vld [vmem:[%s3587_s22 + $0x80] ss:$16 sps:$4 sm:$0xff]  }
 0xa72   : > { %3171 = vmatprep.subr.bf16.mxu1 %v3287_v35 }
 0xa73   : > { %v3427_v13 = vpop.eup %3426 }
 0xa74   : > { %v1699_v31 = vmul.f32 %v3427_v13, %v3419_v20  ;;  %v3226_v9 = vpop.permute.xlu1 %3225  ;;  %v3308_v13 = vld [vmem:[%s3587_s22 + $0x44] ss:$16 sps:$4 sm:$0xff]  }
 0xa75   : > { %3172 = vmatpush3.bf16.msra.mxu1 %v3287_v35  ;;  %v3228_v57 = vunpack.i.h.bf16 %v3226_v9  ;;  %v3227_v58 = vunpack.i.l.bf16 %v3226_v9  ;;  %v3454_v35 = vld [vmem:[#allocation2] sm:$0xff]  ;;  %v3315_v9 = vld [vmem:[%s3587_s22 + $0x68] ss:$16 sps:$4 sm:$0xff]  }
 0xa76   : > { %3173 = vmatprep.subr.bf16.mxu1 %v3288_v36 }
 0xa77   : > { %v3429_v24 = vpop.eup %3428  ;;  %v1846_v60 = vsel %vm803_vm1, %v3740_v32, %v3228_v57  ;;  %v1845_v61 = vsel %vm803_vm1, %v3738_v30, %v3227_v58  ;;  %v3320_v57 = vld [vmem:[%s3587_s22 + $0x84] ss:$16 sps:$4 sm:$0xff]   ;;  %v3323_v58 = vld [vmem:[%s3587_s22 + $0x8c] ss:$16 sps:$4 sm:$0xff]  }
 0xa78   : > { %v1700_v33 = vmul.f32 %v3429_v24, %v3421_v25  ;;  %v3231_v1 = vpop.permute.xlu1 %3230  ;;  %v1850_v2 = vsel %vm1849_vm3, %v1845_v61, %v3237_v63  ;;  %v1851_v3 = vsel %vm1849_vm3, %v1846_v60, %v3238_v62  ;;  %v3311_v24 = vld [vmem:[%s3587_s22 + $0x4c] ss:$16 sps:$4 sm:$0xff]   ;;  %v3321_v60 = vld [vmem:[%s3587_s22 + $0x88] ss:$16 sps:$4 sm:$0xff]   ;;  %v3326_v61 = vld [vmem:[%s3587_s22 + $0xa4] ss:$16 sps:$4 sm:$0xff]  }
 0xa79   : > { %3174 = vmatpush3.bf16.msra.mxu1 %v3288_v36  ;;  %v3233_v30 = vunpack.i.h.bf16 %v3231_v1  ;;  %v3232_v14 = vunpack.i.l.bf16 %v3231_v1  ;;  %v3329_v62 = vld [vmem:[%s3587_s22 + $0xac] ss:$16 sps:$4 sm:$0xff]   ;;  %v3324_v63 = vld [vmem:[%s3587_s22 + $0xa0] ss:$16 sps:$4 sm:$0xff]   ;;  %v3332_v1 = vld [vmem:[%s3587_s22 + $0xc4] ss:$16 sps:$4 sm:$0xff]  }
 0xa7a   : > { %v1702_v0 = vpack.c.bf16 %v1700_v33, %v1699_v31  ;;  %3175 = vmatprep.subr.bf16.mxu1 %v3289_v37  ;;  %v3306_v31 = vld [vmem:[%s3587_s22 + $0x40] ss:$16 sps:$4 sm:$0xff]   ;;  %v3309_v33 = vld [vmem:[%s3587_s22 + $0x48] ss:$16 sps:$4 sm:$0xff]  }
 0xa7b   : > { %v1848_v20 = vsel %vm803_vm1, %v3752_v48, %v3233_v30  ;;  %v1847_v22 = vsel %vm803_vm1, %v3750_v46, %v3232_v14  ;;  %v3294_v46 = vld [vmem:[%s3587_s22] ss:$16 sps:$4 sm:$0xff]   ;;  %v3296_v48 = vld [vmem:[%s3587_s22 + $0x4] ss:$16 sps:$4 sm:$0xff]  }
 0xa7c   : > { %3166 = vmatmul.mubr.msk.bf16.vlgmr.msra.gmra.mrb[36].mxu0 %vm906_vm2, %v1702_v0  ;;  %v3241_v8 = vpop.permute.xlu1 %3240  ;;  %2211 = vmatprep.subr.bf16.mxu0 %v3296_v48 }
 0xa7d   : > { %2243 = vmatprep.mubr.bf16.mxu0 %v3482_v26  ;;  %3176 = vmatpush3.bf16.msra.mxu1 %v3289_v37  ;;  %v3243_v15 = vunpack.i.h.bf16 %v3241_v8  ;;  %v3242_v16 = vunpack.i.l.bf16 %v3241_v8 }
 0xa7e   : > { %3177 = vmatprep.subr.bf16.mxu1 %v3290_v38  ;;  %2212 = vmatpush1.bf16.msra.mxu0 %v3294_v46  ;;  %v2898_v46 = vld [vmem:[%s449_s27] ss:$0 sm:$0xff] }
 0xa7f   : > { %v1852_v10 = vsel %vm1849_vm3, %v1847_v22, %v3242_v16  ;;  %v1853_v28 = vsel %vm1849_vm3, %v1848_v20, %v3243_v15  ;;  %2213 = vmatprep.subr.bf16.mxu0 %v3302_v21 }
 0xa81   : > { %3178 = vmatpush3.bf16.msra.mxu1 %v3290_v38 }
 0xa82   : > { %3179 = vmatprep.subr.bf16.mxu1 %v3291_v39  ;;  %2214 = vmatpush1.bf16.msra.mxu0 %v3300_v7 }
 0xa83   : > { %2215 = vmatprep.subr.bf16.mxu0 %v3308_v13 }
 0xa85   : > { %3180 = vmatpush3.bf16.msra.mxu1 %v3291_v39  ;;  %v3455_v39 = vld [vmem:[#allocation2 + $0x10] sm:$0xff] }
 0xa86   : > { %3181 = vmatprep.subr.bf16.mxu1 %v3292_v40  ;;  %2216 = vmatpush1.bf16.msra.mxu0 %v3306_v31 }
 0xa89   : > { %3182 = vmatpush3.bf16.msra.mxu1 %v3292_v40 }
 0xa8a   : > { %3183 = vmatprep.subr.bf16.mxu1 %v3293_v47 }
 0xa8d   : > { %3184 = vmatpush3.bf16.msra.mxu1 %v3293_v47 }
 0xa8e   : > { %2264 = vmatprep.subr.bf16.mxu1 %v3299_v55 }
 0xb43   : > { %v1743_v41 = vpop.f32.mrb[32].mxu1 }
 0xb44   : > { %v3161_v42 = vpop.f32.mrb[33].mxu1 }
 0xb45   : > { %v1746_v43 = vpop.f32.mrb[34].mxu1 }
 0xb46   : > { %v3244_v44 = vpack.i.bf16 %v1746_v43, %v1743_v41  ;;  %v3162_v45 = vpop.f32.mrb[35].mxu1  ;;  %v3456_v41 = vld [vmem:[#allocation2 + $0x8] sm:$0xff] }
 0xb47   : > { %v3457_v45 = vld [vmem:[#allocation2 + $0x18] sm:$0xff] }
 0xb48   : > { %3245 = vrot.lane.b32.xlu0 %v3244_v44, %s3485_s17 }
 0xb4f   : > { %v1790_v49 = vpop.f32.mrb[36].mxu0 }
 0xb50   : > { %v3167_v50 = vpop.f32.mrb[37].mxu0 }
 0xb51   : > { %v1793_v51 = vpop.f32.mrb[38].mxu0 }
 0xb52   : > { %v3249_v53 = vpack.i.bf16 %v1793_v51, %v1790_v49  ;;  %v3168_v56 = vpop.f32.mrb[39].mxu0  ;;  %v3314_v51 = vld [vmem:[%s3587_s22 + $0x64] ss:$16 sps:$4 sm:$0xff]  }
 0xb53   : > { %v3312_v56 = vld [vmem:[%s3587_s22 + $0x60] ss:$16 sps:$4 sm:$0xff]   ;;  %2217 = vmatprep.subr.bf16.mxu0 %v3314_v51 }
 0xb54   : > { %3250 = vrot.lane.b32.xlu1 %v3249_v53, %s3485_s17  ;;  %v3317_v53 = vld [vmem:[%s3587_s22 + $0x6c] ss:$16 sps:$4 sm:$0xff]   ;;  %2218 = vmatpush1.bf16.msra.mxu0 %v3312_v56  ;;  %v3355_v51 = vld [vmem:[%s3592_s26 + $0x30] sm:$0xff]  }
 0xb55   : > { %2219 = vmatprep.subr.bf16.mxu0 %v3320_v57  ;;  %v3357_v56 = vld [vmem:[%s3592_s26 + $0x38] sm:$0xff]  }
 0xb58   : > { %2220 = vmatpush1.bf16.msra.mxu0 %v3318_v59 }
 0xb59   : > { %2221 = vmatprep.subr.bf16.mxu0 %v3326_v61 }
 0xb5c   : > { %2222 = vmatpush1.bf16.msra.mxu0 %v3324_v63 }
 0xb5d   : > { %2223 = vmatprep.subr.bf16.mxu0 %v3332_v1 }
 0xbba   : > { %v3246_v6 = vpop.permute.xlu0 %3245 }
 0xbbb   : > { %v3248_v17 = vunpack.i.h.bf16 %v3246_v6  ;;  %v3247_v19 = vunpack.i.l.bf16 %v3246_v6  ;;  %v3327_v6 = vld [vmem:[%s3587_s22 + $0xa8] ss:$16 sps:$4 sm:$0xff]  }
 0xbbd   : > { %v1855_v4 = vsel %vm1854_vm4, %v1850_v2, %v3247_v19  ;;  %v1856_v5 = vsel %vm1854_vm4, %v1851_v3, %v3248_v17  ;;  %v3330_v17 = vld [vmem:[%s3587_s22 + $0xc0] ss:$16 sps:$4 sm:$0xff]   ;;  %v3333_v19 = vld [vmem:[%s3587_s22 + $0xc8] ss:$16 sps:$4 sm:$0xff]   ;;  %v3335_v2 = vld [vmem:[%s3587_s22 + $0xcc] ss:$16 sps:$4 sm:$0xff]  }
 0xbbe   : > { %v1859_v32 = vpack.c.bf16 %v1856_v5, %v1855_v4  ;;  %v3338_v3 = vld [vmem:[%s3587_s22 + $0xe4] ss:$16 sps:$4 sm:$0xff]   ;;  %v3341_v4 = vld [vmem:[%s3587_s22 + $0xec] ss:$16 sps:$4 sm:$0xff]   ;;  %2224 = vmatpush1.bf16.msra.mxu0 %v3330_v17  ;;  %v3336_v5 = vld [vmem:[%s3587_s22 + $0xe0] ss:$16 sps:$4 sm:$0xff]  }
 0xbbf   : > { %2225 = vmatprep.subr.bf16.mxu0 %v3338_v3 }
 0xbc0   : > { %3185 = vmatprep.mubr.bf16.mxu1 %v1859_v32  ;;  %v3339_v32 = vld [vmem:[%s3587_s22 + $0xe8] ss:$16 sps:$4 sm:$0xff]  }
 0xbc2   : > { %2226 = vmatpush1.bf16.msra.mxu0 %v3336_v5 }
 0xbc6   : > { %v3251_v18 = vpop.permute.xlu1 %3250 }
 0xbc7   : > { %v3253_v25 = vunpack.i.h.bf16 %v3251_v18  ;;  %v3252_v27 = vunpack.i.l.bf16 %v3251_v18 }
 0xbc9   : > { %v1858_v12 = vsel %vm1854_vm4, %v1853_v28, %v3253_v25  ;;  %v1857_v29 = vsel %vm1854_vm4, %v1852_v10, %v3252_v27 }
 0xbca   : > { %v1860_v52 = vpack.c.bf16 %v1858_v12, %v1857_v29 }
 0xbcc   : > { %3186 = vmatmul.mubr.bf16.vlgmr.msra.gmra.mrb[36].mxu1 %v1860_v52 }
 0xbcd   : > { %2296 = vmatprep.mubr.bf16.mxu1 %v3482_v26  ;;  %2265 = vmatpush1.bf16.msra.mxu1 %v3297_v54 }
 0xbce   : > { %2266 = vmatprep.subr.bf16.mxu1 %v3305_v23 }
 0xbd1   : > { %2267 = vmatpush1.bf16.msra.mxu1 %v3303_v11 }
 0xbd2   : > { %2268 = vmatprep.subr.bf16.mxu1 %v3311_v24 }
 0xbd5   : > { %2269 = vmatpush1.bf16.msra.mxu1 %v3309_v33 }
 0xbd6   : > { %2270 = vmatprep.subr.bf16.mxu1 %v3317_v53  ;;  %v3356_v53 = vld [vmem:[%s3592_s26 + $0x78] sm:$0xff]  }
 0xbd9   : > { %2271 = vmatpush1.bf16.msra.mxu1 %v3315_v9 }
 0xbda   : > { %2272 = vmatprep.subr.bf16.mxu1 %v3323_v58 }
 0xbdd   : > { %2273 = vmatpush1.bf16.msra.mxu1 %v3321_v60 }
 0xbde   : > { %2274 = vmatprep.subr.bf16.mxu1 %v3329_v62 }
 0xbe1   : > { %2275 = vmatpush1.bf16.msra.mxu1 %v3327_v6 }
 0xbe2   : > { %2276 = vmatprep.subr.bf16.mxu1 %v3335_v2 }
 0xbe5   : > { %2277 = vmatpush1.bf16.msra.mxu1 %v3333_v19 }
 0xbe6   : > { %2278 = vmatprep.subr.bf16.mxu1 %v3341_v4 }
 0xbe9   : > { %2279 = vmatpush1.bf16.msra.mxu1 %v3339_v32 }
 0xc9f   : > { %v3187_v0 = vpop.f32.mrb[36].mxu1 }
 0xca0   : > { %v1959_v34 = vpop.f32.mrb[37].mxu1  ;;  %v3945_v40 = vadd.f32 %v3455_v39, %v3187_v0  ;;  %v3342_v0 = vld [vmem:[%s3592_s26 + $0x40] sm:$0xff]   ;;  %v3348_v39 = vld [vmem:[%s3592_s26 + $0x58] sm:$0xff]  }
 0xca1   : > { %v3943_v36 = vadd.f32 %v3454_v35, %v1959_v34  ;;  %v3188_v37 = vpop.f32.mrb[38].mxu1  ;;  %v3343_v34 = vld [vmem:[%s3592_s26] sm:$0xff]   ;;  %3015 = vmatprep.subr.bf16.mxu0 %v3342_v0  ;;  %v3344_v35 = vld [vmem:[%s3592_s26 + $0x48] sm:$0xff]  }
 0xca2   : > { %v1962_v38 = vpop.f32.mrb[39].mxu1  ;;  %v3953_v47 = vadd.f32 %v3457_v45, %v3188_v37  ;;  %v1981_v49 = vmul.f32 %v3945_v40, %v3945_v40  ;;  %v3345_v37 = vld [vmem:[%s3592_s26 + $0x8] sm:$0xff]  }
 0xca3   : > { %v3947_v42 = vadd.f32 %v3456_v41, %v1962_v38  ;;  %v1979_v43 = vmul.f32 %v3943_v36, %v3943_v36  ;;  %v3347_v38 = vld [vmem:[%s3592_s26 + $0x10] sm:$0xff]   ;;  %v3349_v41 = vld [vmem:[%s3592_s26 + $0x18] sm:$0xff]   ;;  %v3352_v45 = vld [vmem:[%s3592_s26 + $0x68] sm:$0xff]  }
 0xca4   : > { %v1982_v50 = vmul.f32 %v3953_v47, %v3953_v47 }
 0xca5   : > { %1983 = vadd.xlane.f32.xlu0 %v1979_v43  ;;  %v1980_v44 = vmul.f32 %v3947_v42, %v3947_v42  ;;  %v3350_v43 = vld [vmem:[%s3592_s26 + $0x60] sm:$0xff]  }
 0xca7   : > { %1985 = vadd.xlane.f32.xlu1 %v1980_v44  ;;  %v3351_v44 = vld [vmem:[%s3592_s26 + $0x20] sm:$0xff]  }
 0xca9   : > { %1987 = vadd.xlane.f32.xlu0 %v1981_v49  ;;  %v3353_v49 = vld [vmem:[%s3592_s26 + $0x28] sm:$0xff]  }
 0xcad   : > { %1989 = vadd.xlane.f32.xlu0 %v1982_v50  ;;  %v3354_v50 = vld [vmem:[%s3592_s26 + $0x70] sm:$0xff]  }
 0xd32   : > { %v1984_v8 = vpop.xlane.xlu0 %1983 }
 0xd33   : > { %v1991_v30 = vmul.f32 0.0078125, %v1984_v8 }
 0xd34   : > { %v1986_v14 = vpop.xlane.xlu1 %1985 }
 0xd35   : > { %v1995_v15 = vadd.f32 1e-06, %v1991_v30  ;;  %v1992_v16 = vmul.f32 0.0078125, %v1986_v14 }
 0xd36   : > { %v1988_v18 = vpop.xlane.xlu0 %1987 }
 0xd37   : > { %3430 = vrsqrt.f32 %v1995_v15  ;;  %v1996_v20 = vadd.f32 1e-06, %v1992_v16  ;;  %v1993_v22 = vmul.f32 0.0078125, %v1988_v18 }
 0xd39   : > { %3432 = vrsqrt.f32 %v1996_v20  ;;  %v1997_v25 = vadd.f32 1e-06, %v1993_v22 }
 0xd3a   : > { %v1990_v27 = vpop.xlane.xlu0 %1989 }
 0xd3b   : > { %v1994_v10 = vmul.f32 0.0078125, %v1990_v27  ;;  %3434 = vrsqrt.f32 %v1997_v25 }
 0xd3d   : > { %v1998_v28 = vadd.f32 1e-06, %v1994_v10 }
 0xd3f   : > { %3436 = vrsqrt.f32 %v1998_v28 }
 0xd41   : > { %v3431_v12 = vpop.eup %3430 }
 0xd42   : > { %v2003_v29 = vmul.f32 %v3431_v12, %v3943_v36 }
 0xd43   : > { %v3433_v52 = vpop.eup %3432 }
 0xd44   : > { %v2004_v48 = vmul.f32 %v3433_v52, %v3947_v42  ;;  %v2013_v54 = vmul.f32 %v2898_v46, %v2003_v29 }
 0xd45   : > { %v3435_v21 = vpop.eup %3434 }
 0xd46   : > { %v2014_v55 = vmul.f32 %v2898_v46, %v2004_v48  ;;  %v2005_v11 = vmul.f32 %v3435_v21, %v3945_v40 }
 0xd48   : > { %v2017_v23 = vpack.c.bf16 %v2014_v55, %v2013_v54  ;;  %v2015_v31 = vmul.f32 %v2898_v46, %v2005_v11 }
 0xd49   : > { %v3437_v7 = vpop.eup %3436 }
 0xd4a   : > { %2244 = vmatmul.mubr.bf16.vlgmr.msra.gmra.mrb[40].mxu0 %v2017_v23  ;;  %2297 = vmatmul.mubr.bf16.vlgmr.msra.gmra.mrb[40].mxu1 %v2017_v23  ;;  %v2006_v13 = vmul.f32 %v3437_v7, %v3953_v47 }
 0xd4b   : > { %2253 = vmatprep.mubr.bf16.mxu0 %v3482_v26  ;;  %2306 = vmatprep.mubr.bf16.mxu1 %v3482_v26  ;;  %v3346_v26 = vld [vmem:[%s3592_s26 + $0x50] sm:$0xff]  }
 0xd4c   : > { %v2016_v24 = vmul.f32 %v2898_v46, %v2006_v13  ;;  %3016 = vmatpush3.bf16.msra.mxu0 %v3343_v34 }
 0xd4d   : > { %3017 = vmatprep.subr.bf16.mxu0 %v3344_v35 }
 0xd4e   : > { %v2018_v33 = vpack.c.bf16 %v2016_v24, %v2015_v31 }
 0xd50   : > { %3018 = vmatpush3.bf16.msra.mxu0 %v3345_v37 }
 0xd51   : > { %3019 = vmatprep.subr.bf16.mxu0 %v3346_v26 }
 0xd52   : > { %2254 = vmatmul.mubr.bf16.gmra.mrb[44].mxu0 %v2018_v33  ;;  %2307 = vmatmul.mubr.bf16.gmra.mrb[44].mxu1 %v2018_v33 }
 0xd54   : > { %3020 = vmatpush3.bf16.msra.mxu0 %v3347_v38 }
 0xd55   : > { %3021 = vmatprep.subr.bf16.mxu0 %v3348_v39 }
 0xd58   : > { %3022 = vmatpush3.bf16.msra.mxu0 %v3349_v41 }
 0xd59   : > { %3023 = vmatprep.subr.bf16.mxu0 %v3350_v43 }
 0xd5c   : > { %3024 = vmatpush3.bf16.msra.mxu0 %v3351_v44 }
 0xd5d   : > { %3025 = vmatprep.subr.bf16.mxu0 %v3352_v45 }
 0xd60   : > { %3026 = vmatpush3.bf16.msra.mxu0 %v3353_v49 }
 0xd61   : > { %3027 = vmatprep.subr.bf16.mxu0 %v3354_v50 }
 0xd64   : > { %3028 = vmatpush3.bf16.msra.mxu0 %v3355_v51 }
 0xd65   : > { %3029 = vmatprep.subr.bf16.mxu0 %v3356_v53 }
 0xd68   : > { %3030 = vmatpush3.bf16.msra.mxu0 %v3357_v56 }
 0xe1d   : > { %v4006_v9 = vpop.f32.mrb[40].mxu0  ;;  %v2298_v57 = vpop.f32.mrb[40].mxu1 }
 0xe1e   : > { %v2325_v58 = vmul.f32 0.044715, %v2298_v57  ;;  %v4008_v59 = vpop.f32.mrb[41].mxu0  ;;  %v2300_v60 = vpop.f32.mrb[41].mxu1  ;;  %v2317_v51 = vmul.f32 0.5, %v2298_v57 }
 0xe1f   : > { %v2326_v61 = vmul.f32 0.044715, %v2300_v60  ;;  %v4010_v62 = vpop.f32.mrb[42].mxu0  ;;  %v4012_v63 = vpop.f32.mrb[42].mxu1 }
 0xe20   : > { %v2333_v6 = vmul.f32 %v2325_v58, %v2298_v57  ;;  %v2327_v1 = vmul.f32 0.044715, %v4012_v63  ;;  %v4015_v17 = vpop.f32.mrb[43].mxu0  ;;  %v4017_v19 = vpop.f32.mrb[43].mxu1 }
 0xe21   : > { %v2334_v2 = vmul.f32 %v2326_v61, %v2300_v60  ;;  %v2328_v3 = vmul.f32 0.044715, %v4017_v19  ;;  %v2318_v61 = vmul.f32 0.5, %v2300_v60 }
 0xe22   : > { %v2341_v4 = vmul.f32 %v2333_v6, %v2298_v57  ;;  %v2335_v5 = vmul.f32 %v2327_v1, %v4012_v63 }
 0xe23   : > { %v2342_v32 = vmul.f32 %v2334_v2, %v2300_v60  ;;  %v2336_v8 = vmul.f32 %v2328_v3, %v4017_v19  ;;  %v2319_v3 = vmul.f32 0.5, %v4012_v63 }
 0xe24   : > { %v2349_v30 = vadd.f32 %v2341_v4, %v2298_v57  ;;  %v2343_v14 = vmul.f32 %v2335_v5, %v4012_v63  ;;  %v2320_v5 = vmul.f32 0.5, %v4017_v19 }
 0xe25   : > { %v2350_v15 = vadd.f32 %v2342_v32, %v2300_v60  ;;  %v2344_v16 = vmul.f32 %v2336_v8, %v4017_v19  ;;  %v4024_v18 = vpop.f32.mrb[44].mxu0  ;;  %v2308_v20 = vpop.f32.mrb[44].mxu1 }
 0xe26   : > { %v2357_v22 = vmul.f32 0.7978846, %v2349_v30  ;;  %v2351_v25 = vadd.f32 %v2343_v14, %v4012_v63  ;;  %v2329_v27 = vmul.f32 0.044715, %v2308_v20  ;;  %v4027_v10 = vpop.f32.mrb[45].mxu0  ;;  %v2310_v29 = vpop.f32.mrb[45].mxu1 }
 0xe27   : > { %v2358_v28 = vmul.f32 0.7978846, %v2350_v15  ;;  %v2352_v12 = vadd.f32 %v2344_v16, %v4017_v19  ;;  %v4030_v52 = vpop.f32.mrb[46].mxu0  ;;  %v2312_v54 = vpop.f32.mrb[46].mxu1  ;;  %v2330_v23 = vmul.f32 0.044715, %v2310_v29 }
 0xe28   : > { %3438 = vtanh.f32 %v2357_v22  ;;  %v2359_v46 = vmul.f32 0.7978846, %v2351_v25  ;;  %v2337_v48 = vmul.f32 %v2329_v27, %v2308_v20  ;;  %v4032_v55 = vpop.f32.mrb[47].mxu0  ;;  %v2314_v7 = vpop.f32.mrb[47].mxu1  ;;  %v2331_v13 = vmul.f32 0.044715, %v2312_v54 }
 0xe29   : > { %3440 = vtanh.f32 %v2358_v28  ;;  %v2360_v21 = vmul.f32 0.7978846, %v2352_v12  ;;  %v2338_v24 = vmul.f32 %v2330_v23, %v2310_v29  ;;  %v2332_v31 = vmul.f32 0.044715, %v2314_v7 }
 0xe2a   : > { %3442 = vtanh.f32 %v2359_v46  ;;  %v2345_v11 = vmul.f32 %v2337_v48, %v2308_v20  ;;  %v2339_v0 = vmul.f32 %v2331_v13, %v2312_v54  ;;  %v2321_v25 = vmul.f32 0.5, %v2308_v20 }
 0xe2b   : > { %3444 = vtanh.f32 %v2360_v21  ;;  %v2346_v34 = vmul.f32 %v2338_v24, %v2310_v29  ;;  %v2340_v35 = vmul.f32 %v2332_v31, %v2314_v7  ;;  %v2322_v48 = vmul.f32 0.5, %v2310_v29 }
 0xe2c   : > { %v2353_v33 = vadd.f32 %v2345_v11, %v2308_v20  ;;  %v2347_v26 = vmul.f32 %v2339_v0, %v2312_v54  ;;  %v2323_v23 = vmul.f32 0.5, %v2312_v54 }
 0xe2d   : > { %v2354_v38 = vadd.f32 %v2346_v34, %v2310_v29  ;;  %v2348_v39 = vmul.f32 %v2340_v35, %v2314_v7 }
 0xe2e   : > { %v2361_v37 = vmul.f32 0.7978846, %v2353_v33  ;;  %v2355_v41 = vadd.f32 %v2347_v26, %v2312_v54 }
 0xe2f   : > { %v2362_v43 = vmul.f32 0.7978846, %v2354_v38  ;;  %v2356_v44 = vadd.f32 %v2348_v39, %v2314_v7 }
 0xe30   : > { %3446 = vtanh.f32 %v2361_v37  ;;  %v2363_v49 = vmul.f32 0.7978846, %v2355_v41 }
 0xe31   : > { %3448 = vtanh.f32 %v2362_v43  ;;  %v2364_v56 = vmul.f32 0.7978846, %v2356_v44 }
 0xe32   : > { %v3439_v45 = vpop.eup %3438  ;;  %3450 = vtanh.f32 %v2363_v49 }
 0xe33   : > { %v3441_v50 = vpop.eup %3440  ;;  %v2373_v53 = vadd.f32 1.0, %v3439_v45  ;;  %3452 = vtanh.f32 %v2364_v56  ;;  %v3461_v56 = vld [vmem:[%s4115_s9 + $0x18] sm:$0xff] (!%p2947_p5)  }
 0xe34   : > { %v3443_v58 = vpop.eup %3442  ;;  %v2374_v6 = vadd.f32 1.0, %v3441_v50  ;;  %v3458_v50 = vld [vmem:[%s4115_s9] sm:$0xff] (!%p2947_p5)  }
 0xe35   : > { %v3445_v1 = vpop.eup %3444  ;;  %v2381_v2 = vmul.f32 %v2373_v53, %v2317_v51  ;;  %v2375_v4 = vadd.f32 1.0, %v3443_v58  ;;  %3189 = vmatprep.subr.bf16.mxu0 (!%p2947_p5), %v3458_v50  ;;  %v3460_v53 = vld [vmem:[%s4115_s9 + $0x10] sm:$0xff] (!%p2947_p5)   ;;  %v3462_v58 = vld [vmem:[%s4115_s9 + $0x20] sm:$0xff] (!%p2947_p5)  }
 0xe36   : > { %v2376_v32 = vadd.f32 1.0, %v3445_v1  ;;  %v2382_v8 = vmul.f32 %v2374_v6, %v2318_v61  ;;  %v3463_v61 = vld [vmem:[%s4115_s9 + $0x28] sm:$0xff] (!%p2947_p5)   ;;  %v3464_v6 = vld [vmem:[%s4115_s9 + $0x30] sm:$0xff] (!%p2947_p5)   ;;  %v3465_v1 = vld [vmem:[%s4115_s9 + $0x38] sm:$0xff] (!%p2947_p5)  }
 0xe37   : > { %v2389_v30 = vmul.f32 %v2381_v2, %v4006_v9  ;;  %v2383_v57 = vmul.f32 %v2375_v4, %v2319_v3 }
 0xe38   : > { %v2384_v14 = vmul.f32 %v2376_v32, %v2320_v5  ;;  %v2390_v15 = vmul.f32 %v2382_v8, %v4008_v59 }
 0xe39   : > { %v2391_v60 = vmul.f32 %v2383_v57, %v4010_v62  ;;  %v2324_v62 = vmul.f32 0.5, %v2314_v7 }
 0xe3a   : > { %v3447_v16 = vpop.eup %3446  ;;  %v2392_v22 = vmul.f32 %v2384_v14, %v4015_v17 }
 0xe3b   : > { %v2397_v27 = vpack.c.bf16 %v2391_v60, %v2389_v30  ;;  %v2377_v63 = vadd.f32 1.0, %v3447_v16  ;;  %v3449_v12 = vpop.eup %3448 }
 0xe3c   : > { %v2398_v28 = vpack.c.bf16 %v2392_v22, %v2390_v15  ;;  %v3451_v19 = vpop.eup %3450  ;;  %v2378_v21 = vadd.f32 1.0, %v3449_v12 }
 0xe3d   : > { %v2385_v46 = vmul.f32 %v2377_v63, %v2321_v25  ;;  %v3453_v9 = vpop.eup %3452  ;;  %v2379_v11 = vadd.f32 1.0, %v3451_v19 }
 0xe3e   : > { %2561 = vmatprep.mubr.bf16.mxu0 %v2398_v28  ;;  %v2380_v13 = vadd.f32 1.0, %v3453_v9  ;;  %v2386_v24 = vmul.f32 %v2378_v21, %v2322_v48  ;;  %v2948_v28 = vld [vmem:[%s4114_s8] ss:$0 sm:$0xff] (!%p2947_p5) }
 0xe3f   : > { %2562 = vmatmul.mubr.bf16.vlgmr.msra.gmra.mrb[48].mxu0 %v2397_v27  ;;  %v2393_v59 = vmul.f32 %v2385_v46, %v4024_v18  ;;  %v2387_v17 = vmul.f32 %v2379_v11, %v2323_v23 }
 0xe40   : > { %v2388_v20 = vmul.f32 %v2380_v13, %v2324_v62  ;;  %v2394_v31 = vmul.f32 %v2386_v24, %v4027_v10  ;;  %3190 = vmatpush3.bf16.msra.mxu0 (!%p2947_p5), %v3458_v50  ;;  %v2949_v13 = vld [vmem:[%s4116_s10] ss:$0 sm:$0xff] (!%p2947_p5) }
 0xe41   : > { %v2395_v33 = vmul.f32 %v2387_v17, %v4030_v52 }
 0xe42   : > { %v2396_v0 = vmul.f32 %v2388_v20, %v4032_v55 }
 0xe43   : > { %v2399_v29 = vpack.c.bf16 %v2395_v33, %v2393_v59 }
 0xe44   : > { %v2400_v34 = vpack.c.bf16 %v2396_v0, %v2394_v31 }
 0xe46   : > { %2569 = vmatprep.mubr.bf16.mxu0 %v2400_v34 }
 0xe47   : > { %2570 = vmatmul.mubr.bf16.gmra.mrb[52].mxu0 %v2399_v29 }
 0xf12   : > { %v3031_v54 = vpop.f32.mrb[48].mxu0 }
 0xf13   : > { %v3032_v35 = vpop.f32.mrb[49].mxu0 }
 0xf14   : > { %v3033_v37 = vadd.f32 %v3032_v35, %v3031_v54  ;;  %v3034_v26 = vpop.f32.mrb[50].mxu0 }
 0xf15   : > { %v3035_v18 = vpop.f32.mrb[51].mxu0 }
 0xf16   : > { %v4045_v7 = vadd.f32 %v3033_v37, %v3943_v36  ;;  %v3036_v38 = vadd.f32 %v3035_v18, %v3034_v26 }
 0xf18   : > { %2582 = vst [vmem:[#allocation2] sm:$0xff] %v4045_v7  ;;  %v4049_v10 = vadd.f32 %v3036_v38, %v3947_v42  ;;  %v2591_v42 = vmul.f32 (!%p2947_p5), %v4045_v7, %v4045_v7 }
 0xf1a   : > { %2583 = vst [vmem:[#allocation2 + $0x8] sm:$0xff] %v4049_v10  ;;  %v3037_v52 = vpop.f32.mrb[52].mxu0  ;;  %2595 = vadd.xlane.f32.xlu0 (!%p2947_p5), %v2591_v42 }
 0xf1b   : > { %v3038_v55 = vpop.f32.mrb[53].mxu0 }
 0xf1c   : > { %v3039_v39 = vadd.f32 %v3038_v55, %v3037_v52  ;;  %v3040_v41 = vpop.f32.mrb[54].mxu0  ;;  %2589 = sbr.rel (%p2947_p5) target bundleno = 4261 (0x10a5), region = 72 }
 0xf1d   : > { %v3041_v43 = vpop.f32.mrb[55].mxu0 }
 0xf1e   : > { %v2580_v44 = vadd.f32 %v3039_v39, %v3945_v40  ;;  %v3042_v45 = vadd.f32 %v3041_v43, %v3040_v41  ;;  %v3459_v40 = vld [vmem:[%s4115_s9 + $0x8] sm:$0xff] (!%p2947_p5)  }
 0xf1f   : > { %3191 = vmatprep.subr.bf16.mxu0 (!%p2947_p5), %v3459_v40 }
 0xf20   : > { %2584 = vst [vmem:[#allocation2 + $0x10] sm:$0xff] %v2580_v44  ;;  %v2581_v36 = vadd.f32 %v3042_v45, %v3953_v47  ;;  %v2593_v49 = vmul.f32 (!%p2947_p5), %v2580_v44, %v2580_v44  ;;  %v2592_v47 = vmul.f32 (!%p2947_p5), %v4049_v10, %v4049_v10  ;;  %3192 = vmatpush3.bf16.msra.mxu0 (!%p2947_p5), %v3459_v40 }
 0xf21   : > { %3193 = vmatprep.subr.bf16.mxu0 (!%p2947_p5), %v3460_v53 }
 0xf22   : > { %2585 = vst [vmem:[#allocation2 + $0x18] sm:$0xff] %v2581_v36  ;;  %2599 = vadd.xlane.f32.xlu1 (!%p2947_p5), %v2593_v49  ;;  %v2594_v51 = vmul.f32 (!%p2947_p5), %v2581_v36, %v2581_v36  ;;  %2597 = vadd.xlane.f32.xlu0 (!%p2947_p5), %v2592_v47 }
 0xf24   : > { %3194 = vmatpush3.bf16.msra.mxu0 %v3460_v53 }
 0xf25   : > { %3195 = vmatprep.subr.bf16.mxu0 %v3461_v56 }
 0xf26   : > { %2601 = vadd.xlane.f32.xlu1 %v2594_v51 }
 0xf28   : > { %3196 = vmatpush3.bf16.msra.mxu0 %v3461_v56 }
 0xf29   : > { %3197 = vmatprep.subr.bf16.mxu0 %v3462_v58 }
 0xf2c   : > { %3198 = vmatpush3.bf16.msra.mxu0 %v3462_v58 }
 0xf2d   : > { %3199 = vmatprep.subr.bf16.mxu0 %v3463_v61 }
 0xf30   : > { %3200 = vmatpush3.bf16.msra.mxu0 %v3463_v61 }
 0xf31   : > { %3201 = vmatprep.subr.bf16.mxu0 %v3464_v6 }
 0xf34   : > { %3202 = vmatpush3.bf16.msra.mxu0 %v3464_v6 }
 0xf35   : > { %3203 = vmatprep.subr.bf16.mxu0 %v3465_v1 }
 0xf38   : > { %3204 = vmatpush3.bf16.msra.mxu0 %v3465_v1 }
 0xfa7   : > { %v2596_v3 = vpop.xlane.xlu0 %2595 }
 0xfa8   : > { %v2603_v5 = vmul.f32 0.0078125, %v2596_v3 }
 0xfaa   : > { %v2607_v8 = vadd.f32 1e-06, %v2603_v5 }
 0xfaf   : > { %v2600_v2 = vpop.xlane.xlu1 %2599  ;;  %v2598_v57 = vpop.xlane.xlu0 %2597 }
 0xfb0   : > { %v2605_v4 = vmul.f32 0.0078125, %v2600_v2  ;;  %v2604_v15 = vmul.f32 0.0078125, %v2598_v57 }
 0xfb2   : > { %v2609_v32 = vadd.f32 1e-06, %v2605_v4  ;;  %v2608_v16 = vadd.f32 1e-06, %v2604_v15 }
 0xfb3   : > { %v2602_v30 = vpop.xlane.xlu1 %2601 }
 0xfb4   : > { %3466 = vrsqrt.f32 %v2609_v32  ;;  %v2606_v14 = vmul.f32 0.0078125, %v2602_v30 }
 0xfb5   : > { %3468 = vrsqrt.f32 %v2607_v8 }
 0xfb6   : > { %v2610_v60 = vadd.f32 1e-06, %v2606_v14 }
 0xfb8   : > { %3470 = vrsqrt.f32 %v2610_v60 }
 0xfb9   : > { %3472 = vrsqrt.f32 %v2608_v16 }
 0xfbe   : > { %v3467_v22 = vpop.eup %3466 }
 0xfbf   : > { %v3469_v25 = vpop.eup %3468  ;;  %v2617_v27 = vmul.f32 %v3467_v22, %v2580_v44 }
 0xfc0   : > { %v2615_v12 = vmul.f32 %v3469_v25, %v4045_v7 }
 0xfc1   : > { %v2627_v9 = vmul.f32 %v2948_v28, %v2617_v27 }
 0xfc2   : > { %v3471_v63 = vpop.eup %3470  ;;  %v2625_v23 = vmul.f32 %v2948_v28, %v2615_v12 }
 0xfc3   : > { %v3473_v46 = vpop.eup %3472  ;;  %v2618_v19 = vmul.f32 %v3471_v63, %v2581_v36 }
 0xfc4   : > { %v2616_v48 = vmul.f32 %v3473_v46, %v4049_v10 }
 0xfc5   : > { %v2628_v21 = vmul.f32 %v2948_v28, %v2618_v19 }
 0xfc6   : > { %v2626_v11 = vmul.f32 %v2948_v28, %v2616_v48 }
 0xfc7   : > { %v2630_v59 = vpack.c.bf16 %v2628_v21, %v2627_v9 }
 0xfc8   : > { %v2629_v62 = vpack.c.bf16 %v2626_v11, %v2625_v23 }
 0xfca   : > { %3205 = vmatprep.mubr.bf16.mxu0 %v2629_v62 }
 0xfcb   : > { %3206 = vmatmul.mubr.bf16.vlgmr.msra.gmra.mrb[0].mxu0 %v2630_v59 }
0x109e   : > { %v3207_v24 = vpop.f32.mrb[0].mxu0 }
0x109f   : > { %v2745_v17 = vadd.f32 %v3207_v24, %v2949_v13  ;;  %v2736_v20 = vpop.f32.mrb[1].mxu0 }
0x10a0   : > { %v2737_v31 = vadd.f32 %v2949_v13, %v2736_v20  ;;  %v3208_v33 = vpop.f32.mrb[2].mxu0 }
0x10a1   : > { %2753 = vst [vmem:[%s4117_s11 + $0x10] sm:$0xff] %v2745_v17  ;;  %v2748_v0 = vadd.f32 %v3208_v33, %v2949_v13  ;;  %v2739_v29 = vpop.f32.mrb[3].mxu0 }
0x10a2   : > { %2751 = vst [vmem:[%s4117_s11] sm:$0xff] %v2737_v31  ;;  %v2740_v34 = vadd.f32 %v2949_v13, %v2739_v29 }
0x10a3   : > { %2754 = vst [vmem:[%s4117_s11 + $0x18] sm:$0xff] %v2748_v0 }
0x10a4   : > { %2752 = vst [vmem:[%s4117_s11 + $0x8] sm:$0xff] %v2740_v34 }
0x10a5 PF: > { %s4121_s23 = sld [smem:[#allocation3_spill]] }
0x10ab   : > { %s21_s17 = sadd.s32 1, %s4121_s23  }
0x10ac   : > { %p18_p6 = scmp.ge.s32.totalorder %s21_s17, 4  }
0x10ae   :  { %20 = sbr.rel (!%p18_p6) target bundleno = 1 (0x1), region = 113 }

</bundles_post_ra>
